<compile_context>
chip_gen: v7x
topology: tpu7x:2x2x1
jax: 0.10.0
libtpu: 0.0.40
codegen_flags: <defaults>
</compile_context>

<pallas_src>
import functools
import math

import jax
import jax.numpy as jnp
from jax import lax
from jax.experimental import pallas as pl
from jax.experimental.pallas import tpu as pltpu


def _layernorm(x, g, b, eps=1e-5):
    mu = jnp.mean(x, axis=-1, keepdims=True)
    var = jnp.mean((x - mu) ** 2, axis=-1, keepdims=True)
    return (x - mu) * lax.rsqrt(var + eps) * g + b


def char_gpt_kernel(tok_ref,                    # (1, Bl, T) int32
                    embed_ref,                  # (Vp, C)  padded embedding table
                    wq_ref, bq_ref,             # (L, C, C), (L, 1, C)
                    wk_ref, bk_ref,
                    wv_ref, bv_ref,
                    wo_ref, bo_ref,
                    ln1g_ref, ln1b_ref,         # (L, 1, C)
                    w1_ref, b1_ref,             # (L, C, C), (L, 1, C)
                    ln2g_ref, ln2b_ref,         # (L, 1, C)
                    lnfg_ref, lnfb_ref,         # (1, C)
                    wout_ref,                   # (C, Vp)  lane-dense padded
                    out_ref,                    # (Bl, T, Vp)
                    *, n_layer, seq_len, n_embd, rows_per_program, vocab_pad):
    T, C = seq_len, n_embd
    Bl, Vp = rows_per_program, vocab_pad
    M = Bl * T
    scale = 1.0 / math.sqrt(C)

    # ---- embedding gather as ONE one-hot MXU matmul (no serial scalar loads) ----
    toks = tok_ref[...].reshape(M, 1)                                    # (M, 1) int32
    vocab_iota = lax.broadcasted_iota(jnp.int32, (M, Vp), 1)
    one_hot = (vocab_iota == toks).astype(jnp.float32)                   # (M, Vp)
    x = jnp.dot(one_hot, embed_ref[...], preferred_element_type=jnp.float32)  # (M, C)

    # additive causal bias (finite, no select / no -inf), hoisted out of layers
    row = lax.broadcasted_iota(jnp.int32, (T, T), 0)
    col = lax.broadcasted_iota(jnp.int32, (T, T), 1)
    mask_bias = jnp.where(col <= row, 0.0, -1e9).astype(jnp.float32)

    qk_dims = (((1,), (1,)), ((), ()))   # contract last dims: q @ k.T w/o transpose

    def layer_body(l, x):
        # ---- lane-aligned q/k/v projections (separate (C,C) matmuls) ----
        q = jnp.dot(x, wq_ref[l], preferred_element_type=jnp.float32) + bq_ref[l]
        k = jnp.dot(x, wk_ref[l], preferred_element_type=jnp.float32) + bk_ref[l]
        v = jnp.dot(x, wv_ref[l], preferred_element_type=jnp.float32) + bv_ref[l]

        # ---- causal attention per batch row (Bl is tiny; static unroll) ----
        attn_rows = []
        for r in range(Bl):
            qr = q[r * T:(r + 1) * T, :]
            kr = k[r * T:(r + 1) * T, :]
            vr = v[r * T:(r + 1) * T, :]
            s = lax.dot_general(qr, kr, qk_dims,
                                preferred_element_type=jnp.float32)      # (T, T)
            s = s * scale + mask_bias
            s = s - jnp.max(s, axis=-1, keepdims=True)
            p = jnp.exp(s)
            p = p * pl.reciprocal(jnp.sum(p, axis=-1, keepdims=True), approx=True)
            attn_rows.append(jnp.dot(p, vr, preferred_element_type=jnp.float32))
        attn = attn_rows[0] if Bl == 1 else jnp.concatenate(attn_rows, axis=0)

        attn = jnp.dot(attn, wo_ref[l],
                       preferred_element_type=jnp.float32) + bo_ref[l]

        # ---- residual + norm1, linear "ffn" + residual + norm2 ----
        x = _layernorm(x + attn, ln1g_ref[l], ln1b_ref[l])
        ffn = jnp.dot(x, w1_ref[l], preferred_element_type=jnp.float32) + b1_ref[l]
        x = _layernorm(x + ffn, ln2g_ref[l], ln2b_ref[l])
        return x

    x = lax.fori_loop(0, n_layer, layer_body, x, unroll=True)

    # ---- final norm + lane-dense vocab projection ----
    x = _layernorm(x, lnfg_ref[...], lnfb_ref[...])
    logits = jnp.dot(x, wout_ref[...], preferred_element_type=jnp.float32)   # (M, Vp)
    out_ref[...] = logits.reshape(Bl, T, Vp)


# ------------- one-time parameter prep (hoisted out of the call path) ----------
def prepare_params(params):
    V, C = params['embed'].shape
    Vp = max(128, ((V + 127) // 128) * 128)
    prepared = dict(params)
    prepared['embed_p'] = jnp.zeros((Vp, C), jnp.float32).at[:V, :].set(params['embed'])
    prepared['w_out_p'] = jnp.zeros((C, Vp), jnp.float32).at[:, :V].set(params['w_out'])
    prepared['vocab_size'] = V
    prepared['vocab_pad'] = Vp
    return prepared


def char_gpt_forward(tokens, prepared, *, num_programs=None):
    B, T = tokens.shape
    Vp, C = prepared['embed_p'].shape
    V = prepared['vocab_size']
    L = prepared['wq'].shape[0]

    # Grid sized to TensorCores: 2-wide parallel grid when the batch splits
    # evenly (feeds both v7x cores), otherwise a single program (v5e/v6e are
    # single-TC; the batch is folded into the matmul M dimension either way).
    G = num_programs if num_programs is not None else (2 if (B >= 2 and B % 2 == 0) else 1)
    Bl = B // G
    tok3 = tokens.astype(jnp.int32).reshape(G, Bl, T)

    args = (prepared['embed_p'],
            prepared['wq'], prepared['bq'], prepared['wk'], prepared['bk'],
            prepared['wv'], prepared['bv'], prepared['wo'], prepared['bo'],
            prepared['ln1_g'], prepared['ln1_b'], prepared['w1'], prepared['b1'],
            prepared['ln2_g'], prepared['ln2_b'],
            prepared['lnf_g'], prepared['lnf_b'], prepared['w_out_p'])

    flops = int(2 * B * T * Vp * C                       # one-hot gather
                + L * (10 * B * T * C * C + 4 * B * T * T * C)
                + 2 * B * T * C * Vp)                    # vocab projection
    transcendentals = int(B * L * (T * T + 2 * T) + B * T * (2 * L + 1))
    bytes_accessed = int(tok3.size * 4 + sum(int(a.size) * 4 for a in args)
                         + B * T * Vp * 4)

    kernel = functools.partial(char_gpt_kernel, n_layer=L, seq_len=T, n_embd=C,
                               rows_per_program=Bl, vocab_pad=Vp)

    tok_spec = pl.BlockSpec((1, Bl, T), lambda g: (g, 0, 0))
    weight_specs = [pl.BlockSpec(memory_space=pltpu.MemorySpace.VMEM) for _ in args]

    out = pl.pallas_call(
        kernel,
        out_shape=jax.ShapeDtypeStruct((B, T, Vp), jnp.float32),
        grid_spec=pltpu.PrefetchScalarGridSpec(
            num_scalar_prefetch=0,
            grid=(G,),
            in_specs=[tok_spec] + weight_specs,
            out_specs=pl.BlockSpec((Bl, T, Vp), lambda g: (g, 0, 0)),
        ),
        compiler_params=pltpu.CompilerParams(
            dimension_semantics=("parallel",),
            vmem_limit_bytes=32 * 1024 * 1024),
        cost_estimate=pl.CostEstimate(flops=flops,
                                      transcendentals=transcendentals,
                                      bytes_accessed=bytes_accessed),
    )(tok3, *args)

    return out[:, :, :V]        # slice vocab padding off (drop if consumer masks it)


# ----------------------- parameter init (deterministic) -----------------------
def init_params(key, vocab_size, n_embd, n_layer):
    ks = iter(jax.random.split(key, 32))

    def lin_w(k, fan_in, shape):
        b = 1.0 / math.sqrt(fan_in)
        return jax.random.uniform(k, shape, jnp.float32, -b, b)

    L, C, V = n_layer, n_embd, vocab_size
    return {
        'embed': jax.random.normal(next(ks), (V, C), jnp.float32),
        'wq': lin_w(next(ks), C, (L, C, C)), 'bq': lin_w(next(ks), C, (L, 1, C)),
        'wk': lin_w(next(ks), C, (L, C, C)), 'bk': lin_w(next(ks), C, (L, 1, C)),
        'wv': lin_w(next(ks), C, (L, C, C)), 'bv': lin_w(next(ks), C, (L, 1, C)),
        'wo': lin_w(next(ks), C, (L, C, C)), 'bo': lin_w(next(ks), C, (L, 1, C)),
        'w1': lin_w(next(ks), C, (L, C, C)), 'b1': lin_w(next(ks), C, (L, 1, C)),
        'ln1_g': jnp.ones((L, 1, C), jnp.float32),
        'ln1_b': jnp.zeros((L, 1, C), jnp.float32),
        'ln2_g': jnp.ones((L, 1, C), jnp.float32),
        'ln2_b': jnp.zeros((L, 1, C), jnp.float32),
        'lnf_g': jnp.ones((1, C), jnp.float32),
        'lnf_b': jnp.zeros((1, C), jnp.float32),
        'w_out': lin_w(next(ks), C, (C, V)),
    }


# ----------------------- pure-JAX reference (for checking) --------------------
def ref_forward(tokens, params):
    x = params['embed'][tokens]
    L = params['wq'].shape[0]
    C = x.shape[-1]
    T = x.shape[1]
    mask = jnp.tril(jnp.ones((T, T), bool))[None]
    for l in range(L):
        q = x @ params['wq'][l] + params['bq'][l]
        k = x @ params['wk'][l] + params['bk'][l]
        v = x @ params['wv'][l] + params['bv'][l]
        s = jnp.einsum('bqc,bkc->bqk', q, k) / math.sqrt(C)
        s = jnp.where(mask, s, -jnp.inf)
        p = jax.nn.softmax(s, axis=-1)
        a = jnp.einsum('bqk,bkc->bqc', p, v) @ params['wo'][l] + params['bo'][l]
        x = x + a
        x = _layernorm(x, params['ln1_g'][l], params['ln1_b'][l])
        f = x @ params['w1'][l] + params['b1'][l]
        x = x + f
        x = _layernorm(x, params['ln2_g'][l], params['ln2_b'][l])
    x = _layernorm(x, params['lnf_g'], params['lnf_b'])
    return x @ params['w_out']


if __name__ == "__main__":
    block_size = 8
    n_embd = 32
    n_layer = 2
    vocab_size = 65
    batch = 2
    seq = 8                     # t <= block_size

    key = jax.random.PRNGKey(0)
    kp, kt = jax.random.split(key)
    params = init_params(kp, vocab_size, n_embd, n_layer)
    tokens = jax.random.randint(kt, (batch, seq), 0, vocab_size, jnp.int32)

    prepared = prepare_params(params)       # one-time weight prep (hoisted)

    logits = char_gpt_forward(tokens, prepared)
    logits = jax.block_until_ready(logits)

    ref = ref_forward(tokens, params)
    assert logits.shape == (batch, seq, vocab_size)
    # tolerance is slightly loose because the in-kernel softmax denominator uses
    # the approximate EUP reciprocal (pl.reciprocal(..., approx=True)).
    assert jnp.allclose(logits, ref, atol=1e-2, rtol=1e-2), "mismatch vs JAX reference"

    print("KERNEL_OK")
</pallas_src>

<mosaic_0001>
module attributes {stable_mosaic.version = 11 : i64} {
  func.func @char_gpt_kernel(%arg0: i32, %arg1: memref<1x1x8xi32, #tpu.memory_space<vmem>>, %arg2: memref<128x32xf32, #tpu.memory_space<vmem>>, %arg3: memref<2x32x32xf32, #tpu.memory_space<vmem>>, %arg4: memref<2x1x32xf32, #tpu.memory_space<vmem>>, %arg5: memref<2x32x32xf32, #tpu.memory_space<vmem>>, %arg6: memref<2x1x32xf32, #tpu.memory_space<vmem>>, %arg7: memref<2x32x32xf32, #tpu.memory_space<vmem>>, %arg8: memref<2x1x32xf32, #tpu.memory_space<vmem>>, %arg9: memref<2x32x32xf32, #tpu.memory_space<vmem>>, %arg10: memref<2x1x32xf32, #tpu.memory_space<vmem>>, %arg11: memref<2x1x32xf32, #tpu.memory_space<vmem>>, %arg12: memref<2x1x32xf32, #tpu.memory_space<vmem>>, %arg13: memref<2x32x32xf32, #tpu.memory_space<vmem>>, %arg14: memref<2x1x32xf32, #tpu.memory_space<vmem>>, %arg15: memref<2x1x32xf32, #tpu.memory_space<vmem>>, %arg16: memref<2x1x32xf32, #tpu.memory_space<vmem>>, %arg17: memref<1x32xf32, #tpu.memory_space<vmem>>, %arg18: memref<1x32xf32, #tpu.memory_space<vmem>>, %arg19: memref<32x128xf32, #tpu.memory_space<vmem>>, %arg20: memref<1x8x128xf32, #tpu.memory_space<vmem>>) attributes {dimension_semantics = [#tpu.dimension_semantics<parallel>], iteration_bounds = array<i64: 2>, scalar_prefetch = 0 : i64, scratch_operands = 0 : i64, tpu.core_type = #tpu.core_type<tc>, window_params = [{transform_indices = @transform_0, window_bounds = array<i64: 1, 1, 8>}, {pipeline_mode = #tpu.pipeline_mode<synchronous>, transform_indices = @transform_1, window_bounds = array<i64: 128, 32>}, {pipeline_mode = #tpu.pipeline_mode<synchronous>, transform_indices = @transform_2, window_bounds = array<i64: 2, 32, 32>}, {pipeline_mode = #tpu.pipeline_mode<synchronous>, transform_indices = @transform_3, window_bounds = array<i64: 2, 1, 32>}, {pipeline_mode = #tpu.pipeline_mode<synchronous>, transform_indices = @transform_4, window_bounds = array<i64: 2, 32, 32>}, {pipeline_mode = #tpu.pipeline_mode<synchronous>, transform_indices = @transform_5, window_bounds = array<i64: 2, 1, 32>}, {pipeline_mode = #tpu.pipeline_mode<synchronous>, transform_indices = @transform_6, window_bounds = array<i64: 2, 32, 32>}, {pipeline_mode = #tpu.pipeline_mode<synchronous>, transform_indices = @transform_7, window_bounds = array<i64: 2, 1, 32>}, {pipeline_mode = #tpu.pipeline_mode<synchronous>, transform_indices = @transform_8, window_bounds = array<i64: 2, 32, 32>}, {pipeline_mode = #tpu.pipeline_mode<synchronous>, transform_indices = @transform_9, window_bounds = array<i64: 2, 1, 32>}, {pipeline_mode = #tpu.pipeline_mode<synchronous>, transform_indices = @transform_10, window_bounds = array<i64: 2, 1, 32>}, {pipeline_mode = #tpu.pipeline_mode<synchronous>, transform_indices = @transform_11, window_bounds = array<i64: 2, 1, 32>}, {pipeline_mode = #tpu.pipeline_mode<synchronous>, transform_indices = @transform_12, window_bounds = array<i64: 2, 32, 32>}, {pipeline_mode = #tpu.pipeline_mode<synchronous>, transform_indices = @transform_13, window_bounds = array<i64: 2, 1, 32>}, {pipeline_mode = #tpu.pipeline_mode<synchronous>, transform_indices = @transform_14, window_bounds = array<i64: 2, 1, 32>}, {pipeline_mode = #tpu.pipeline_mode<synchronous>, transform_indices = @transform_15, window_bounds = array<i64: 2, 1, 32>}, {pipeline_mode = #tpu.pipeline_mode<synchronous>, transform_indices = @transform_16, window_bounds = array<i64: 1, 32>}, {pipeline_mode = #tpu.pipeline_mode<synchronous>, transform_indices = @transform_17, window_bounds = array<i64: 1, 32>}, {pipeline_mode = #tpu.pipeline_mode<synchronous>, transform_indices = @transform_18, window_bounds = array<i64: 32, 128>}, {transform_indices = @transform_19, window_bounds = array<i64: 1, 8, 128>}]} {
    %c0 = arith.constant 0 : index
    %c0_0 = arith.constant 0 : index
    %c0_1 = arith.constant 0 : index
    %0 = vector.load %arg1[%c0, %c0_0, %c0_1] : memref<1x1x8xi32, #tpu.memory_space<vmem>>, vector<1x1x8xi32>
    %1 = vector.shape_cast %0 : vector<1x1x8xi32> to vector<8x1xi32>
    %2 = tpu.iota {dimensions = array<i32: 1>} : vector<8x128xi32>
    %3 = vector.broadcast %1 : vector<8x1xi32> to vector<8x128xi32>
    %4 = arith.cmpi eq, %2, %3 : vector<8x128xi32>
    %5 = arith.extui %4 : vector<8x128xi1> to vector<8x128xi32>
    %6 = arith.sitofp %5 : vector<8x128xi32> to vector<8x128xf32>
    %c0_2 = arith.constant 0 : index
    %c0_3 = arith.constant 0 : index
    %7 = vector.load %arg2[%c0_2, %c0_3] : memref<128x32xf32, #tpu.memory_space<vmem>>, vector<128x32xf32>
    %cst = arith.constant dense<0.000000e+00> : vector<8x32xf32>
    %8 = tpu.matmul %6, %7, %cst {dimension_numbers = #tpu.dot_dimension_numbers<[1], [0], [0], [1], [0, 0, 1, 1], [], []>} : vector<8x128xf32>, vector<128x32xf32>, vector<8x32xf32> -> vector<8x32xf32>
    %9 = tpu.iota {dimensions = array<i32: 0>} : vector<8x8xi32>
    %10 = tpu.iota {dimensions = array<i32: 1>} : vector<8x8xi32>
    %11 = arith.cmpi sle, %10, %9 : vector<8x8xi32>
    %cst_4 = arith.constant 0.000000e+00 : f32
    %cst_5 = arith.constant -1.000000e+09 : f32
    %12 = vector.broadcast %cst_4 : f32 to vector<8x8xf32>
    %13 = vector.broadcast %cst_5 : f32 to vector<8x8xf32>
    %14 = arith.select %11, %12, %13 : vector<8x8xi1>, vector<8x8xf32>
    %c0_i32 = arith.constant 0 : i32
    %15 = arith.index_cast %c0_i32 : i32 to index
    %c0_6 = arith.constant 0 : index
    %c0_7 = arith.constant 0 : index
    %16 = vector.load %arg3[%15, %c0_6, %c0_7] : memref<2x32x32xf32, #tpu.memory_space<vmem>>, vector<1x32x32xf32>
    %17 = vector.shape_cast %16 : vector<1x32x32xf32> to vector<32x32xf32>
    %cst_8 = arith.constant dense<0.000000e+00> : vector<8x32xf32>
    %18 = tpu.matmul %8, %17, %cst_8 {dimension_numbers = #tpu.dot_dimension_numbers<[1], [0], [0], [1], [0, 0, 1, 1], [], []>} : vector<8x32xf32>, vector<32x32xf32>, vector<8x32xf32> -> vector<8x32xf32>
    %19 = arith.index_cast %c0_i32 : i32 to index
    %c0_9 = arith.constant 0 : index
    %c0_10 = arith.constant 0 : index
    %20 = vector.load %arg4[%19, %c0_9, %c0_10] : memref<2x1x32xf32, #tpu.memory_space<vmem>>, vector<1x1x32xf32>
    %21 = vector.shape_cast %20 : vector<1x1x32xf32> to vector<1x32xf32>
    %22 = vector.broadcast %21 : vector<1x32xf32> to vector<8x32xf32>
    %23 = arith.addf %18, %22 : vector<8x32xf32>
    %24 = arith.index_cast %c0_i32 : i32 to index
    %c0_11 = arith.constant 0 : index
    %c0_12 = arith.constant 0 : index
    %25 = vector.load %arg5[%24, %c0_11, %c0_12] : memref<2x32x32xf32, #tpu.memory_space<vmem>>, vector<1x32x32xf32>
    %26 = vector.shape_cast %25 : vector<1x32x32xf32> to vector<32x32xf32>
    %cst_13 = arith.constant dense<0.000000e+00> : vector<8x32xf32>
    %27 = tpu.matmul %8, %26, %cst_13 {dimension_numbers = #tpu.dot_dimension_numbers<[1], [0], [0], [1], [0, 0, 1, 1], [], []>} : vector<8x32xf32>, vector<32x32xf32>, vector<8x32xf32> -> vector<8x32xf32>
    %28 = arith.index_cast %c0_i32 : i32 to index
    %c0_14 = arith.constant 0 : index
    %c0_15 = arith.constant 0 : index
    %29 = vector.load %arg6[%28, %c0_14, %c0_15] : memref<2x1x32xf32, #tpu.memory_space<vmem>>, vector<1x1x32xf32>
    %30 = vector.shape_cast %29 : vector<1x1x32xf32> to vector<1x32xf32>
    %31 = vector.broadcast %30 : vector<1x32xf32> to vector<8x32xf32>
    %32 = arith.addf %27, %31 : vector<8x32xf32>
    %33 = arith.index_cast %c0_i32 : i32 to index
    %c0_16 = arith.constant 0 : index
    %c0_17 = arith.constant 0 : index
    %34 = vector.load %arg7[%33, %c0_16, %c0_17] : memref<2x32x32xf32, #tpu.memory_space<vmem>>, vector<1x32x32xf32>
    %35 = vector.shape_cast %34 : vector<1x32x32xf32> to vector<32x32xf32>
    %cst_18 = arith.constant dense<0.000000e+00> : vector<8x32xf32>
    %36 = tpu.matmul %8, %35, %cst_18 {dimension_numbers = #tpu.dot_dimension_numbers<[1], [0], [0], [1], [0, 0, 1, 1], [], []>} : vector<8x32xf32>, vector<32x32xf32>, vector<8x32xf32> -> vector<8x32xf32>
    %37 = arith.index_cast %c0_i32 : i32 to index
    %c0_19 = arith.constant 0 : index
    %c0_20 = arith.constant 0 : index
    %38 = vector.load %arg8[%37, %c0_19, %c0_20] : memref<2x1x32xf32, #tpu.memory_space<vmem>>, vector<1x1x32xf32>
    %39 = vector.shape_cast %38 : vector<1x1x32xf32> to vector<1x32xf32>
    %40 = vector.broadcast %39 : vector<1x32xf32> to vector<8x32xf32>
    %41 = arith.addf %36, %40 : vector<8x32xf32>
    %cst_21 = arith.constant dense<0.000000e+00> : vector<8x8xf32>
    %42 = tpu.matmul %23, %32, %cst_21 {dimension_numbers = #tpu.dot_dimension_numbers<[1], [1], [0], [0], [0, 0, 1, 0], [], []>} : vector<8x32xf32>, vector<8x32xf32>, vector<8x8xf32> -> vector<8x8xf32>
    %cst_22 = arith.constant 0.176776692 : f32
    %43 = vector.broadcast %cst_22 : f32 to vector<8x8xf32>
    %44 = arith.mulf %42, %43 : vector<8x8xf32>
    %45 = arith.addf %44, %14 : vector<8x8xf32>
    %cst_23 = arith.constant dense<0xFF800000> : vector<8xf32>
    %46 = vector.multi_reduction <maximumf>, %45, %cst_23 [1] : vector<8x8xf32> to vector<8xf32>
    %47 = vector.shape_cast %46 : vector<8xf32> to vector<8x1xf32>
    %48 = vector.broadcast %47 : vector<8x1xf32> to vector<8x8xf32>
    %49 = arith.subf %45, %48 : vector<8x8xf32>
    %50 = math.exp %49 : vector<8x8xf32>
    %cst_24 = arith.constant dense<0.000000e+00> : vector<8xf32>
    %51 = vector.multi_reduction <add>, %50, %cst_24 [1] : vector<8x8xf32> to vector<8xf32>
    %52 = vector.shape_cast %51 : vector<8xf32> to vector<8x1xf32>
    %53 = tpu.reciprocal %52 {approx = true} : vector<8x1xf32> -> vector<8x1xf32>
    %54 = vector.broadcast %53 : vector<8x1xf32> to vector<8x8xf32>
    %55 = arith.mulf %50, %54 : vector<8x8xf32>
    %cst_25 = arith.constant dense<0.000000e+00> : vector<8x32xf32>
    %56 = tpu.matmul %55, %41, %cst_25 {dimension_numbers = #tpu.dot_dimension_numbers<[1], [0], [0], [1], [0, 0, 1, 1], [], []>} : vector<8x8xf32>, vector<8x32xf32>, vector<8x32xf32> -> vector<8x32xf32>
    %57 = arith.index_cast %c0_i32 : i32 to index
    %c0_26 = arith.constant 0 : index
    %c0_27 = arith.constant 0 : index
    %58 = vector.load %arg9[%57, %c0_26, %c0_27] : memref<2x32x32xf32, #tpu.memory_space<vmem>>, vector<1x32x32xf32>
    %59 = vector.shape_cast %58 : vector<1x32x32xf32> to vector<32x32xf32>
    %cst_28 = arith.constant dense<0.000000e+00> : vector<8x32xf32>
    %60 = tpu.matmul %56, %59, %cst_28 {dimension_numbers = #tpu.dot_dimension_numbers<[1], [0], [0], [1], [0, 0, 1, 1], [], []>} : vector<8x32xf32>, vector<32x32xf32>, vector<8x32xf32> -> vector<8x32xf32>
    %61 = arith.index_cast %c0_i32 : i32 to index
    %c0_29 = arith.constant 0 : index
    %c0_30 = arith.constant 0 : index
    %62 = vector.load %arg10[%61, %c0_29, %c0_30] : memref<2x1x32xf32, #tpu.memory_space<vmem>>, vector<1x1x32xf32>
    %63 = vector.shape_cast %62 : vector<1x1x32xf32> to vector<1x32xf32>
    %64 = vector.broadcast %63 : vector<1x32xf32> to vector<8x32xf32>
    %65 = arith.addf %60, %64 : vector<8x32xf32>
    %66 = arith.addf %8, %65 : vector<8x32xf32>
    %67 = arith.index_cast %c0_i32 : i32 to index
    %c0_31 = arith.constant 0 : index
    %c0_32 = arith.constant 0 : index
    %68 = vector.load %arg11[%67, %c0_31, %c0_32] : memref<2x1x32xf32, #tpu.memory_space<vmem>>, vector<1x1x32xf32>
    %69 = vector.shape_cast %68 : vector<1x1x32xf32> to vector<1x32xf32>
    %70 = arith.index_cast %c0_i32 : i32 to index
    %c0_33 = arith.constant 0 : index
    %c0_34 = arith.constant 0 : index
    %71 = vector.load %arg12[%70, %c0_33, %c0_34] : memref<2x1x32xf32, #tpu.memory_space<vmem>>, vector<1x1x32xf32>
    %72 = vector.shape_cast %71 : vector<1x1x32xf32> to vector<1x32xf32>
    %cst_35 = arith.constant dense<0.000000e+00> : vector<8xf32>
    %73 = vector.multi_reduction <add>, %66, %cst_35 [1] : vector<8x32xf32> to vector<8xf32>
    %74 = vector.shape_cast %73 : vector<8xf32> to vector<8x1xf32>
    %cst_36 = arith.constant 3.200000e+01 : f32
    %75 = vector.broadcast %cst_36 : f32 to vector<8x1xf32>
    %76 = arith.divf %74, %75 : vector<8x1xf32>
    %77 = vector.broadcast %76 : vector<8x1xf32> to vector<8x32xf32>
    %78 = arith.subf %66, %77 : vector<8x32xf32>
    %79 = arith.mulf %78, %78 : vector<8x32xf32>
    %cst_37 = arith.constant dense<0.000000e+00> : vector<8xf32>
    %80 = vector.multi_reduction <add>, %79, %cst_37 [1] : vector<8x32xf32> to vector<8xf32>
    %81 = vector.shape_cast %80 : vector<8xf32> to vector<8x1xf32>
    %cst_38 = arith.constant 3.200000e+01 : f32
    %82 = vector.broadcast %cst_38 : f32 to vector<8x1xf32>
    %83 = arith.divf %81, %82 : vector<8x1xf32>
    %84 = vector.broadcast %76 : vector<8x1xf32> to vector<8x32xf32>
    %85 = arith.subf %66, %84 : vector<8x32xf32>
    %cst_39 = arith.constant 9.99999974E-6 : f32
    %86 = vector.broadcast %cst_39 : f32 to vector<8x1xf32>
    %87 = arith.addf %83, %86 : vector<8x1xf32>
    %88 = math.rsqrt %87 : vector<8x1xf32>
    %89 = vector.broadcast %88 : vector<8x1xf32> to vector<8x32xf32>
    %90 = arith.mulf %85, %89 : vector<8x32xf32>
    %91 = vector.broadcast %69 : vector<1x32xf32> to vector<8x32xf32>
    %92 = arith.mulf %90, %91 : vector<8x32xf32>
    %93 = vector.broadcast %72 : vector<1x32xf32> to vector<8x32xf32>
    %94 = arith.addf %92, %93 : vector<8x32xf32>
    %95 = arith.index_cast %c0_i32 : i32 to index
    %c0_40 = arith.constant 0 : index
    %c0_41 = arith.constant 0 : index
    %96 = vector.load %arg13[%95, %c0_40, %c0_41] : memref<2x32x32xf32, #tpu.memory_space<vmem>>, vector<1x32x32xf32>
    %97 = vector.shape_cast %96 : vector<1x32x32xf32> to vector<32x32xf32>
    %cst_42 = arith.constant dense<0.000000e+00> : vector<8x32xf32>
    %98 = tpu.matmul %94, %97, %cst_42 {dimension_numbers = #tpu.dot_dimension_numbers<[1], [0], [0], [1], [0, 0, 1, 1], [], []>} : vector<8x32xf32>, vector<32x32xf32>, vector<8x32xf32> -> vector<8x32xf32>
    %99 = arith.index_cast %c0_i32 : i32 to index
    %c0_43 = arith.constant 0 : index
    %c0_44 = arith.constant 0 : index
    %100 = vector.load %arg14[%99, %c0_43, %c0_44] : memref<2x1x32xf32, #tpu.memory_space<vmem>>, vector<1x1x32xf32>
    %101 = vector.shape_cast %100 : vector<1x1x32xf32> to vector<1x32xf32>
    %102 = vector.broadcast %101 : vector<1x32xf32> to vector<8x32xf32>
    %103 = arith.addf %98, %102 : vector<8x32xf32>
    %104 = arith.addf %94, %103 : vector<8x32xf32>
    %105 = arith.index_cast %c0_i32 : i32 to index
    %c0_45 = arith.constant 0 : index
    %c0_46 = arith.constant 0 : index
    %106 = vector.load %arg15[%105, %c0_45, %c0_46] : memref<2x1x32xf32, #tpu.memory_space<vmem>>, vector<1x1x32xf32>
    %107 = vector.shape_cast %106 : vector<1x1x32xf32> to vector<1x32xf32>
    %108 = arith.index_cast %c0_i32 : i32 to index
    %c0_47 = arith.constant 0 : index
    %c0_48 = arith.constant 0 : index
    %109 = vector.load %arg16[%108, %c0_47, %c0_48] : memref<2x1x32xf32, #tpu.memory_space<vmem>>, vector<1x1x32xf32>
    %110 = vector.shape_cast %109 : vector<1x1x32xf32> to vector<1x32xf32>
    %cst_49 = arith.constant dense<0.000000e+00> : vector<8xf32>
    %111 = vector.multi_reduction <add>, %104, %cst_49 [1] : vector<8x32xf32> to vector<8xf32>
    %112 = vector.shape_cast %111 : vector<8xf32> to vector<8x1xf32>
    %cst_50 = arith.constant 3.200000e+01 : f32
    %113 = vector.broadcast %cst_50 : f32 to vector<8x1xf32>
    %114 = arith.divf %112, %113 : vector<8x1xf32>
    %115 = vector.broadcast %114 : vector<8x1xf32> to vector<8x32xf32>
    %116 = arith.subf %104, %115 : vector<8x32xf32>
    %117 = arith.mulf %116, %116 : vector<8x32xf32>
    %cst_51 = arith.constant dense<0.000000e+00> : vector<8xf32>
    %118 = vector.multi_reduction <add>, %117, %cst_51 [1] : vector<8x32xf32> to vector<8xf32>
    %119 = vector.shape_cast %118 : vector<8xf32> to vector<8x1xf32>
    %cst_52 = arith.constant 3.200000e+01 : f32
    %120 = vector.broadcast %cst_52 : f32 to vector<8x1xf32>
    %121 = arith.divf %119, %120 : vector<8x1xf32>
    %122 = vector.broadcast %114 : vector<8x1xf32> to vector<8x32xf32>
    %123 = arith.subf %104, %122 : vector<8x32xf32>
    %cst_53 = arith.constant 9.99999974E-6 : f32
    %124 = vector.broadcast %cst_53 : f32 to vector<8x1xf32>
    %125 = arith.addf %121, %124 : vector<8x1xf32>
    %126 = math.rsqrt %125 : vector<8x1xf32>
    %127 = vector.broadcast %126 : vector<8x1xf32> to vector<8x32xf32>
    %128 = arith.mulf %123, %127 : vector<8x32xf32>
    %129 = vector.broadcast %107 : vector<1x32xf32> to vector<8x32xf32>
    %130 = arith.mulf %128, %129 : vector<8x32xf32>
    %131 = vector.broadcast %110 : vector<1x32xf32> to vector<8x32xf32>
    %132 = arith.addf %130, %131 : vector<8x32xf32>
    %c1_i32 = arith.constant 1 : i32
    %133 = arith.index_cast %c1_i32 : i32 to index
    %c0_54 = arith.constant 0 : index
    %c0_55 = arith.constant 0 : index
    %134 = vector.load %arg3[%133, %c0_54, %c0_55] : memref<2x32x32xf32, #tpu.memory_space<vmem>>, vector<1x32x32xf32>
    %135 = vector.shape_cast %134 : vector<1x32x32xf32> to vector<32x32xf32>
    %cst_56 = arith.constant dense<0.000000e+00> : vector<8x32xf32>
    %136 = tpu.matmul %132, %135, %cst_56 {dimension_numbers = #tpu.dot_dimension_numbers<[1], [0], [0], [1], [0, 0, 1, 1], [], []>} : vector<8x32xf32>, vector<32x32xf32>, vector<8x32xf32> -> vector<8x32xf32>
    %137 = arith.index_cast %c1_i32 : i32 to index
    %c0_57 = arith.constant 0 : index
    %c0_58 = arith.constant 0 : index
    %138 = vector.load %arg4[%137, %c0_57, %c0_58] : memref<2x1x32xf32, #tpu.memory_space<vmem>>, vector<1x1x32xf32>
    %139 = vector.shape_cast %138 : vector<1x1x32xf32> to vector<1x32xf32>
    %140 = vector.broadcast %139 : vector<1x32xf32> to vector<8x32xf32>
    %141 = arith.addf %136, %140 : vector<8x32xf32>
    %142 = arith.index_cast %c1_i32 : i32 to index
    %c0_59 = arith.constant 0 : index
    %c0_60 = arith.constant 0 : index
    %143 = vector.load %arg5[%142, %c0_59, %c0_60] : memref<2x32x32xf32, #tpu.memory_space<vmem>>, vector<1x32x32xf32>
    %144 = vector.shape_cast %143 : vector<1x32x32xf32> to vector<32x32xf32>
    %cst_61 = arith.constant dense<0.000000e+00> : vector<8x32xf32>
    %145 = tpu.matmul %132, %144, %cst_61 {dimension_numbers = #tpu.dot_dimension_numbers<[1], [0], [0], [1], [0, 0, 1, 1], [], []>} : vector<8x32xf32>, vector<32x32xf32>, vector<8x32xf32> -> vector<8x32xf32>
    %146 = arith.index_cast %c1_i32 : i32 to index
    %c0_62 = arith.constant 0 : index
    %c0_63 = arith.constant 0 : index
    %147 = vector.load %arg6[%146, %c0_62, %c0_63] : memref<2x1x32xf32, #tpu.memory_space<vmem>>, vector<1x1x32xf32>
    %148 = vector.shape_cast %147 : vector<1x1x32xf32> to vector<1x32xf32>
    %149 = vector.broadcast %148 : vector<1x32xf32> to vector<8x32xf32>
    %150 = arith.addf %145, %149 : vector<8x32xf32>
    %151 = arith.index_cast %c1_i32 : i32 to index
    %c0_64 = arith.constant 0 : index
    %c0_65 = arith.constant 0 : index
    %152 = vector.load %arg7[%151, %c0_64, %c0_65] : memref<2x32x32xf32, #tpu.memory_space<vmem>>, vector<1x32x32xf32>
    %153 = vector.shape_cast %152 : vector<1x32x32xf32> to vector<32x32xf32>
    %cst_66 = arith.constant dense<0.000000e+00> : vector<8x32xf32>
    %154 = tpu.matmul %132, %153, %cst_66 {dimension_numbers = #tpu.dot_dimension_numbers<[1], [0], [0], [1], [0, 0, 1, 1], [], []>} : vector<8x32xf32>, vector<32x32xf32>, vector<8x32xf32> -> vector<8x32xf32>
    %155 = arith.index_cast %c1_i32 : i32 to index
    %c0_67 = arith.constant 0 : index
    %c0_68 = arith.constant 0 : index
    %156 = vector.load %arg8[%155, %c0_67, %c0_68] : memref<2x1x32xf32, #tpu.memory_space<vmem>>, vector<1x1x32xf32>
    %157 = vector.shape_cast %156 : vector<1x1x32xf32> to vector<1x32xf32>
    %158 = vector.broadcast %157 : vector<1x32xf32> to vector<8x32xf32>
    %159 = arith.addf %154, %158 : vector<8x32xf32>
    %cst_69 = arith.constant dense<0.000000e+00> : vector<8x8xf32>
    %160 = tpu.matmul %141, %150, %cst_69 {dimension_numbers = #tpu.dot_dimension_numbers<[1], [1], [0], [0], [0, 0, 1, 0], [], []>} : vector<8x32xf32>, vector<8x32xf32>, vector<8x8xf32> -> vector<8x8xf32>
    %cst_70 = arith.constant 0.176776692 : f32
    %161 = vector.broadcast %cst_70 : f32 to vector<8x8xf32>
    %162 = arith.mulf %160, %161 : vector<8x8xf32>
    %163 = arith.addf %162, %14 : vector<8x8xf32>
    %cst_71 = arith.constant dense<0xFF800000> : vector<8xf32>
    %164 = vector.multi_reduction <maximumf>, %163, %cst_71 [1] : vector<8x8xf32> to vector<8xf32>
    %165 = vector.shape_cast %164 : vector<8xf32> to vector<8x1xf32>
    %166 = vector.broadcast %165 : vector<8x1xf32> to vector<8x8xf32>
    %167 = arith.subf %163, %166 : vector<8x8xf32>
    %168 = math.exp %167 : vector<8x8xf32>
    %cst_72 = arith.constant dense<0.000000e+00> : vector<8xf32>
    %169 = vector.multi_reduction <add>, %168, %cst_72 [1] : vector<8x8xf32> to vector<8xf32>
    %170 = vector.shape_cast %169 : vector<8xf32> to vector<8x1xf32>
    %171 = tpu.reciprocal %170 {approx = true} : vector<8x1xf32> -> vector<8x1xf32>
    %172 = vector.broadcast %171 : vector<8x1xf32> to vector<8x8xf32>
    %173 = arith.mulf %168, %172 : vector<8x8xf32>
    %cst_73 = arith.constant dense<0.000000e+00> : vector<8x32xf32>
    %174 = tpu.matmul %173, %159, %cst_73 {dimension_numbers = #tpu.dot_dimension_numbers<[1], [0], [0], [1], [0, 0, 1, 1], [], []>} : vector<8x8xf32>, vector<8x32xf32>, vector<8x32xf32> -> vector<8x32xf32>
    %175 = arith.index_cast %c1_i32 : i32 to index
    %c0_74 = arith.constant 0 : index
    %c0_75 = arith.constant 0 : index
    %176 = vector.load %arg9[%175, %c0_74, %c0_75] : memref<2x32x32xf32, #tpu.memory_space<vmem>>, vector<1x32x32xf32>
    %177 = vector.shape_cast %176 : vector<1x32x32xf32> to vector<32x32xf32>
    %cst_76 = arith.constant dense<0.000000e+00> : vector<8x32xf32>
    %178 = tpu.matmul %174, %177, %cst_76 {dimension_numbers = #tpu.dot_dimension_numbers<[1], [0], [0], [1], [0, 0, 1, 1], [], []>} : vector<8x32xf32>, vector<32x32xf32>, vector<8x32xf32> -> vector<8x32xf32>
    %179 = arith.index_cast %c1_i32 : i32 to index
    %c0_77 = arith.constant 0 : index
    %c0_78 = arith.constant 0 : index
    %180 = vector.load %arg10[%179, %c0_77, %c0_78] : memref<2x1x32xf32, #tpu.memory_space<vmem>>, vector<1x1x32xf32>
    %181 = vector.shape_cast %180 : vector<1x1x32xf32> to vector<1x32xf32>
    %182 = vector.broadcast %181 : vector<1x32xf32> to vector<8x32xf32>
    %183 = arith.addf %178, %182 : vector<8x32xf32>
    %184 = arith.addf %132, %183 : vector<8x32xf32>
    %185 = arith.index_cast %c1_i32 : i32 to index
    %c0_79 = arith.constant 0 : index
    %c0_80 = arith.constant 0 : index
    %186 = vector.load %arg11[%185, %c0_79, %c0_80] : memref<2x1x32xf32, #tpu.memory_space<vmem>>, vector<1x1x32xf32>
    %187 = vector.shape_cast %186 : vector<1x1x32xf32> to vector<1x32xf32>
    %188 = arith.index_cast %c1_i32 : i32 to index
    %c0_81 = arith.constant 0 : index
    %c0_82 = arith.constant 0 : index
    %189 = vector.load %arg12[%188, %c0_81, %c0_82] : memref<2x1x32xf32, #tpu.memory_space<vmem>>, vector<1x1x32xf32>
    %190 = vector.shape_cast %189 : vector<1x1x32xf32> to vector<1x32xf32>
    %cst_83 = arith.constant dense<0.000000e+00> : vector<8xf32>
    %191 = vector.multi_reduction <add>, %184, %cst_83 [1] : vector<8x32xf32> to vector<8xf32>
    %192 = vector.shape_cast %191 : vector<8xf32> to vector<8x1xf32>
    %cst_84 = arith.constant 3.200000e+01 : f32
    %193 = vector.broadcast %cst_84 : f32 to vector<8x1xf32>
    %194 = arith.divf %192, %193 : vector<8x1xf32>
    %195 = vector.broadcast %194 : vector<8x1xf32> to vector<8x32xf32>
    %196 = arith.subf %184, %195 : vector<8x32xf32>
    %197 = arith.mulf %196, %196 : vector<8x32xf32>
    %cst_85 = arith.constant dense<0.000000e+00> : vector<8xf32>
    %198 = vector.multi_reduction <add>, %197, %cst_85 [1] : vector<8x32xf32> to vector<8xf32>
    %199 = vector.shape_cast %198 : vector<8xf32> to vector<8x1xf32>
    %cst_86 = arith.constant 3.200000e+01 : f32
    %200 = vector.broadcast %cst_86 : f32 to vector<8x1xf32>
    %201 = arith.divf %199, %200 : vector<8x1xf32>
    %202 = vector.broadcast %194 : vector<8x1xf32> to vector<8x32xf32>
    %203 = arith.subf %184, %202 : vector<8x32xf32>
    %cst_87 = arith.constant 9.99999974E-6 : f32
    %204 = vector.broadcast %cst_87 : f32 to vector<8x1xf32>
    %205 = arith.addf %201, %204 : vector<8x1xf32>
    %206 = math.rsqrt %205 : vector<8x1xf32>
    %207 = vector.broadcast %206 : vector<8x1xf32> to vector<8x32xf32>
    %208 = arith.mulf %203, %207 : vector<8x32xf32>
    %209 = vector.broadcast %187 : vector<1x32xf32> to vector<8x32xf32>
    %210 = arith.mulf %208, %209 : vector<8x32xf32>
    %211 = vector.broadcast %190 : vector<1x32xf32> to vector<8x32xf32>
    %212 = arith.addf %210, %211 : vector<8x32xf32>
    %213 = arith.index_cast %c1_i32 : i32 to index
    %c0_88 = arith.constant 0 : index
    %c0_89 = arith.constant 0 : index
    %214 = vector.load %arg13[%213, %c0_88, %c0_89] : memref<2x32x32xf32, #tpu.memory_space<vmem>>, vector<1x32x32xf32>
    %215 = vector.shape_cast %214 : vector<1x32x32xf32> to vector<32x32xf32>
    %cst_90 = arith.constant dense<0.000000e+00> : vector<8x32xf32>
    %216 = tpu.matmul %212, %215, %cst_90 {dimension_numbers = #tpu.dot_dimension_numbers<[1], [0], [0], [1], [0, 0, 1, 1], [], []>} : vector<8x32xf32>, vector<32x32xf32>, vector<8x32xf32> -> vector<8x32xf32>
    %217 = arith.index_cast %c1_i32 : i32 to index
    %c0_91 = arith.constant 0 : index
    %c0_92 = arith.constant 0 : index
    %218 = vector.load %arg14[%217, %c0_91, %c0_92] : memref<2x1x32xf32, #tpu.memory_space<vmem>>, vector<1x1x32xf32>
    %219 = vector.shape_cast %218 : vector<1x1x32xf32> to vector<1x32xf32>
    %220 = vector.broadcast %219 : vector<1x32xf32> to vector<8x32xf32>
    %221 = arith.addf %216, %220 : vector<8x32xf32>
    %222 = arith.addf %212, %221 : vector<8x32xf32>
    %223 = arith.index_cast %c1_i32 : i32 to index
    %c0_93 = arith.constant 0 : index
    %c0_94 = arith.constant 0 : index
    %224 = vector.load %arg15[%223, %c0_93, %c0_94] : memref<2x1x32xf32, #tpu.memory_space<vmem>>, vector<1x1x32xf32>
    %225 = vector.shape_cast %224 : vector<1x1x32xf32> to vector<1x32xf32>
    %226 = arith.index_cast %c1_i32 : i32 to index
    %c0_95 = arith.constant 0 : index
    %c0_96 = arith.constant 0 : index
    %227 = vector.load %arg16[%226, %c0_95, %c0_96] : memref<2x1x32xf32, #tpu.memory_space<vmem>>, vector<1x1x32xf32>
    %228 = vector.shape_cast %227 : vector<1x1x32xf32> to vector<1x32xf32>
    %cst_97 = arith.constant dense<0.000000e+00> : vector<8xf32>
    %229 = vector.multi_reduction <add>, %222, %cst_97 [1] : vector<8x32xf32> to vector<8xf32>
    %230 = vector.shape_cast %229 : vector<8xf32> to vector<8x1xf32>
    %cst_98 = arith.constant 3.200000e+01 : f32
    %231 = vector.broadcast %cst_98 : f32 to vector<8x1xf32>
    %232 = arith.divf %230, %231 : vector<8x1xf32>
    %233 = vector.broadcast %232 : vector<8x1xf32> to vector<8x32xf32>
    %234 = arith.subf %222, %233 : vector<8x32xf32>
    %235 = arith.mulf %234, %234 : vector<8x32xf32>
    %cst_99 = arith.constant dense<0.000000e+00> : vector<8xf32>
    %236 = vector.multi_reduction <add>, %235, %cst_99 [1] : vector<8x32xf32> to vector<8xf32>
    %237 = vector.shape_cast %236 : vector<8xf32> to vector<8x1xf32>
    %cst_100 = arith.constant 3.200000e+01 : f32
    %238 = vector.broadcast %cst_100 : f32 to vector<8x1xf32>
    %239 = arith.divf %237, %238 : vector<8x1xf32>
    %240 = vector.broadcast %232 : vector<8x1xf32> to vector<8x32xf32>
    %241 = arith.subf %222, %240 : vector<8x32xf32>
    %cst_101 = arith.constant 9.99999974E-6 : f32
    %242 = vector.broadcast %cst_101 : f32 to vector<8x1xf32>
    %243 = arith.addf %239, %242 : vector<8x1xf32>
    %244 = math.rsqrt %243 : vector<8x1xf32>
    %245 = vector.broadcast %244 : vector<8x1xf32> to vector<8x32xf32>
    %246 = arith.mulf %241, %245 : vector<8x32xf32>
    %247 = vector.broadcast %225 : vector<1x32xf32> to vector<8x32xf32>
    %248 = arith.mulf %246, %247 : vector<8x32xf32>
    %249 = vector.broadcast %228 : vector<1x32xf32> to vector<8x32xf32>
    %250 = arith.addf %248, %249 : vector<8x32xf32>
    %c2_i32 = arith.constant 2 : i32
    %c0_102 = arith.constant 0 : index
    %c0_103 = arith.constant 0 : index
    %251 = vector.load %arg17[%c0_102, %c0_103] : memref<1x32xf32, #tpu.memory_space<vmem>>, vector<1x32xf32>
    %c0_104 = arith.constant 0 : index
    %c0_105 = arith.constant 0 : index
    %252 = vector.load %arg18[%c0_104, %c0_105] : memref<1x32xf32, #tpu.memory_space<vmem>>, vector<1x32xf32>
    %cst_106 = arith.constant dense<0.000000e+00> : vector<8xf32>
    %253 = vector.multi_reduction <add>, %250, %cst_106 [1] : vector<8x32xf32> to vector<8xf32>
    %254 = vector.shape_cast %253 : vector<8xf32> to vector<8x1xf32>
    %cst_107 = arith.constant 3.200000e+01 : f32
    %255 = vector.broadcast %cst_107 : f32 to vector<8x1xf32>
    %256 = arith.divf %254, %255 : vector<8x1xf32>
    %257 = vector.broadcast %256 : vector<8x1xf32> to vector<8x32xf32>
    %258 = arith.subf %250, %257 : vector<8x32xf32>
    %259 = arith.mulf %258, %258 : vector<8x32xf32>
    %cst_108 = arith.constant dense<0.000000e+00> : vector<8xf32>
    %260 = vector.multi_reduction <add>, %259, %cst_108 [1] : vector<8x32xf32> to vector<8xf32>
    %261 = vector.shape_cast %260 : vector<8xf32> to vector<8x1xf32>
    %cst_109 = arith.constant 3.200000e+01 : f32
    %262 = vector.broadcast %cst_109 : f32 to vector<8x1xf32>
    %263 = arith.divf %261, %262 : vector<8x1xf32>
    %264 = vector.broadcast %256 : vector<8x1xf32> to vector<8x32xf32>
    %265 = arith.subf %250, %264 : vector<8x32xf32>
    %cst_110 = arith.constant 9.99999974E-6 : f32
    %266 = vector.broadcast %cst_110 : f32 to vector<8x1xf32>
    %267 = arith.addf %263, %266 : vector<8x1xf32>
    %268 = math.rsqrt %267 : vector<8x1xf32>
    %269 = vector.broadcast %268 : vector<8x1xf32> to vector<8x32xf32>
    %270 = arith.mulf %265, %269 : vector<8x32xf32>
    %271 = vector.broadcast %251 : vector<1x32xf32> to vector<8x32xf32>
    %272 = arith.mulf %270, %271 : vector<8x32xf32>
    %273 = vector.broadcast %252 : vector<1x32xf32> to vector<8x32xf32>
    %274 = arith.addf %272, %273 : vector<8x32xf32>
    %c0_111 = arith.constant 0 : index
    %c0_112 = arith.constant 0 : index
    %275 = vector.load %arg19[%c0_111, %c0_112] : memref<32x128xf32, #tpu.memory_space<vmem>>, vector<32x128xf32>
    %cst_113 = arith.constant dense<0.000000e+00> : vector<8x128xf32>
    %276 = tpu.matmul %274, %275, %cst_113 {dimension_numbers = #tpu.dot_dimension_numbers<[1], [0], [0], [1], [0, 0, 1, 1], [], []>} : vector<8x32xf32>, vector<32x128xf32>, vector<8x128xf32> -> vector<8x128xf32>
    %277 = vector.shape_cast %276 : vector<8x128xf32> to vector<1x8x128xf32>
    %c0_114 = arith.constant 0 : index
    %c0_115 = arith.constant 0 : index
    %c0_116 = arith.constant 0 : index
    %278 = vector.load %arg20[%c0_114, %c0_115, %c0_116] : memref<1x8x128xf32, #tpu.memory_space<vmem>>, vector<1x8x128xf32>
    tpu.vector_store %arg20[%c0_114, %c0_115, %c0_116], %277 {strides = array<i32>} : memref<1x8x128xf32, #tpu.memory_space<vmem>>, vector<1x8x128xf32>,
    return
  }
  func.func @transform_0(%arg0: i32) -> (i32, i32, i32) {
    %c0_i32 = arith.constant 0 : i32
    %c0_i32_0 = arith.constant 0 : i32
    %c0_i32_1 = arith.constant 0 : i32
    return %arg0, %c0_i32, %c0_i32_0 : i32, i32, i32
  }
  func.func @transform_1(%arg0: i32) -> (i32, i32) {
    %c0_i32 = arith.constant 0 : i32
    %c0_i32_0 = arith.constant 0 : i32
    %c0_i32_1 = arith.constant 0 : i32
    return %c0_i32, %c0_i32_0 : i32, i32
  }
  func.func @transform_2(%arg0: i32) -> (i32, i32, i32) {
    %c0_i32 = arith.constant 0 : i32
    %c0_i32_0 = arith.constant 0 : i32
    %c0_i32_1 = arith.constant 0 : i32
    %c0_i32_2 = arith.constant 0 : i32
    return %c0_i32, %c0_i32_0, %c0_i32_1 : i32, i32, i32
  }
  func.func @transform_3(%arg0: i32) -> (i32, i32, i32) {
    %c0_i32 = arith.constant 0 : i32
    %c0_i32_0 = arith.constant 0 : i32
    %c0_i32_1 = arith.constant 0 : i32
    %c0_i32_2 = arith.constant 0 : i32
    return %c0_i32, %c0_i32_0, %c0_i32_1 : i32, i32, i32
  }
  func.func @transform_4(%arg0: i32) -> (i32, i32, i32) {
    %c0_i32 = arith.constant 0 : i32
    %c0_i32_0 = arith.constant 0 : i32
    %c0_i32_1 = arith.constant 0 : i32
    %c0_i32_2 = arith.constant 0 : i32
    return %c0_i32, %c0_i32_0, %c0_i32_1 : i32, i32, i32
  }
  func.func @transform_5(%arg0: i32) -> (i32, i32, i32) {
    %c0_i32 = arith.constant 0 : i32
    %c0_i32_0 = arith.constant 0 : i32
    %c0_i32_1 = arith.constant 0 : i32
    %c0_i32_2 = arith.constant 0 : i32
    return %c0_i32, %c0_i32_0, %c0_i32_1 : i32, i32, i32
  }
  func.func @transform_6(%arg0: i32) -> (i32, i32, i32) {
    %c0_i32 = arith.constant 0 : i32
    %c0_i32_0 = arith.constant 0 : i32
    %c0_i32_1 = arith.constant 0 : i32
    %c0_i32_2 = arith.constant 0 : i32
    return %c0_i32, %c0_i32_0, %c0_i32_1 : i32, i32, i32
  }
  func.func @transform_7(%arg0: i32) -> (i32, i32, i32) {
    %c0_i32 = arith.constant 0 : i32
    %c0_i32_0 = arith.constant 0 : i32
    %c0_i32_1 = arith.constant 0 : i32
    %c0_i32_2 = arith.constant 0 : i32
    return %c0_i32, %c0_i32_0, %c0_i32_1 : i32, i32, i32
  }
  func.func @transform_8(%arg0: i32) -> (i32, i32, i32) {
    %c0_i32 = arith.constant 0 : i32
    %c0_i32_0 = arith.constant 0 : i32
    %c0_i32_1 = arith.constant 0 : i32
    %c0_i32_2 = arith.constant 0 : i32
    return %c0_i32, %c0_i32_0, %c0_i32_1 : i32, i32, i32
  }
  func.func @transform_9(%arg0: i32) -> (i32, i32, i32) {
    %c0_i32 = arith.constant 0 : i32
    %c0_i32_0 = arith.constant 0 : i32
    %c0_i32_1 = arith.constant 0 : i32
    %c0_i32_2 = arith.constant 0 : i32
    return %c0_i32, %c0_i32_0, %c0_i32_1 : i32, i32, i32
  }
  func.func @transform_10(%arg0: i32) -> (i32, i32, i32) {
    %c0_i32 = arith.constant 0 : i32
    %c0_i32_0 = arith.constant 0 : i32
    %c0_i32_1 = arith.constant 0 : i32
    %c0_i32_2 = arith.constant 0 : i32
    return %c0_i32, %c0_i32_0, %c0_i32_1 : i32, i32, i32
  }
  func.func @transform_11(%arg0: i32) -> (i32, i32, i32) {
    %c0_i32 = arith.constant 0 : i32
    %c0_i32_0 = arith.constant 0 : i32
    %c0_i32_1 = arith.constant 0 : i32
    %c0_i32_2 = arith.constant 0 : i32
    return %c0_i32, %c0_i32_0, %c0_i32_1 : i32, i32, i32
  }
  func.func @transform_12(%arg0: i32) -> (i32, i32, i32) {
    %c0_i32 = arith.constant 0 : i32
    %c0_i32_0 = arith.constant 0 : i32
    %c0_i32_1 = arith.constant 0 : i32
    %c0_i32_2 = arith.constant 0 : i32
    return %c0_i32, %c0_i32_0, %c0_i32_1 : i32, i32, i32
  }
  func.func @transform_13(%arg0: i32) -> (i32, i32, i32) {
    %c0_i32 = arith.constant 0 : i32
    %c0_i32_0 = arith.constant 0 : i32
    %c0_i32_1 = arith.constant 0 : i32
    %c0_i32_2 = arith.constant 0 : i32
    return %c0_i32, %c0_i32_0, %c0_i32_1 : i32, i32, i32
  }
  func.func @transform_14(%arg0: i32) -> (i32, i32, i32) {
    %c0_i32 = arith.constant 0 : i32
    %c0_i32_0 = arith.constant 0 : i32
    %c0_i32_1 = arith.constant 0 : i32
    %c0_i32_2 = arith.constant 0 : i32
    return %c0_i32, %c0_i32_0, %c0_i32_1 : i32, i32, i32
  }
  func.func @transform_15(%arg0: i32) -> (i32, i32, i32) {
    %c0_i32 = arith.constant 0 : i32
    %c0_i32_0 = arith.constant 0 : i32
    %c0_i32_1 = arith.constant 0 : i32
    %c0_i32_2 = arith.constant 0 : i32
    return %c0_i32, %c0_i32_0, %c0_i32_1 : i32, i32, i32
  }
  func.func @transform_16(%arg0: i32) -> (i32, i32) {
    %c0_i32 = arith.constant 0 : i32
    %c0_i32_0 = arith.constant 0 : i32
    %c0_i32_1 = arith.constant 0 : i32
    return %c0_i32, %c0_i32_0 : i32, i32
  }
  func.func @transform_17(%arg0: i32) -> (i32, i32) {
    %c0_i32 = arith.constant 0 : i32
    %c0_i32_0 = arith.constant 0 : i32
    %c0_i32_1 = arith.constant 0 : i32
    return %c0_i32, %c0_i32_0 : i32, i32
  }
  func.func @transform_18(%arg0: i32) -> (i32, i32) {
    %c0_i32 = arith.constant 0 : i32
    %c0_i32_0 = arith.constant 0 : i32
    %c0_i32_1 = arith.constant 0 : i32
    return %c0_i32, %c0_i32_0 : i32, i32
  }
  func.func @transform_19(%arg0: i32) -> (i32, i32, i32) {
    %c0_i32 = arith.constant 0 : i32
    %c0_i32_0 = arith.constant 0 : i32
    %c0_i32_1 = arith.constant 0 : i32
    return %arg0, %c0_i32, %c0_i32_0 : i32, i32, i32
  }
}

</mosaic_0001>

<bundles_post_ra>
// kernel: tpu_custom_call.1
= control target key start
LH: loop header
LB: loop body
LE: loop exit
PB: predicated region body
PF: predicated region fallthrough
CT: control target
= control target key end

     0   :  { %s4481_s0 = inlined_call_operand.hbm [shape: s32[2,1,8], index: 0, kind: input, shape index: {}]   ;;  %s4482_s1 = inlined_call_operand.vmem [shape: f32[128,32], index: 1, kind: input, shape index: {}]   ;;  %s4483_s2 = inlined_call_operand.vmem [shape: f32[2,32,32], index: 2, kind: input, shape index: {}]   ;;  %s4484_s3 = inlined_call_operand.hbm [shape: f32[2,1,32], index: 3, kind: input, shape index: {}]   ;;  %s4485_s4 = inlined_call_operand.vmem [shape: f32[2,32,32], index: 4, kind: input, shape index: {}]   ;;  %s4486_s5 = inlined_call_operand.hbm [shape: f32[2,1,32], index: 5, kind: input, shape index: {}]   ;;  %s4487_s6 = inlined_call_operand.hbm [shape: f32[2,32,32], index: 6, kind: input, shape index: {}]   ;;  %s4488_s7 = inlined_call_operand.hbm [shape: f32[2,1,32], index: 7, kind: input, shape index: {}]   ;;  %s4489_s8 = inlined_call_operand.hbm [shape: f32[2,32,32], index: 8, kind: input, shape index: {}]   ;;  %s4490_s9 = inlined_call_operand.hbm [shape: f32[2,1,32], index: 9, kind: input, shape index: {}]   ;;  %s4491_s10 = inlined_call_operand.hbm [shape: f32[2,1,32], index: 10, kind: input, shape index: {}]   ;;  %s4492_s11 = inlined_call_operand.hbm [shape: f32[2,1,32], index: 11, kind: input, shape index: {}]   ;;  %s4493_s12 = inlined_call_operand.vmem [shape: f32[2,32,32], index: 12, kind: input, shape index: {}]   ;;  %s4494_s13 = inlined_call_operand.hbm [shape: f32[2,1,32], index: 13, kind: input, shape index: {}]   ;;  %s4495_s14 = inlined_call_operand.hbm [shape: f32[2,1,32], index: 14, kind: input, shape index: {}]   ;;  %s4496_s15 = inlined_call_operand.hbm [shape: f32[2,1,32], index: 15, kind: input, shape index: {}]   ;;  %s4497_s16 = inlined_call_operand.hbm [shape: f32[1,32], index: 16, kind: input, shape index: {}]   ;;  %s4498_s17 = inlined_call_operand.hbm [shape: f32[1,32], index: 17, kind: input, shape index: {}]   ;;  %s4499_s18 = inlined_call_operand.vmem [shape: f32[32,128], index: 18, kind: input, shape index: {}]   ;;  %s4500_s19 = inlined_call_operand.hbm [shape: f32[2,8,128], index: 19, kind: output, shape index: {}]  }
   0x1   :  { %4523 = sst [smem:[#allocation39_spill]] %s4481_s0 }
   0x2   :  { %4524 = sst [smem:[#allocation40_spill]] %s4482_s1 }
   0x3   :  { %4525 = sst [smem:[#allocation41_spill]] %s4483_s2 }
   0x4   :  { %4526 = sst [smem:[#allocation42_spill]] %s4484_s3 }
   0x5   :  { %4527 = sst [smem:[#allocation43_spill]] %s4485_s4 }
   0x6   :  { %4528 = sst [smem:[#allocation44_spill]] %s4486_s5 }
   0x7   :  { %4529 = sst [smem:[#allocation45_spill]] %s4487_s6 }
   0x8   :  { %4530 = sst [smem:[#allocation46_spill]] %s4488_s7 }
   0x9   :  { %4531 = sst [smem:[#allocation47_spill]] %s4489_s8 }
   0xa   :  { %4532 = sst [smem:[#allocation48_spill]] %s4490_s9 }
   0xb   :  { %4533 = sst [smem:[#allocation49_spill]] %s4493_s12 }
   0xc   :  { %4534 = sst [smem:[#allocation50_spill]] %s4499_s18 }
   0xd   :  { %4535 = sst [smem:[#allocation51_spill]] %s4500_s19 }
   0xe   :  { %24 = vsyncpa [#allocation3], 0 }
   0xf   :  { %26 = vsyncpa [#allocation3 + $0x1], 0 }
  0x10   :  { %27 = vsyncpa [#allocation6], 0 }
  0x11   :  { %28 = vsyncpa [#allocation9], 0 }
  0x12   :  { %29 = vsyncpa [#allocation12], 0 }
  0x13   :  { %30 = vsyncpa [#allocation15], 0 }
  0x14   :  { %31 = vsyncpa [#allocation18], 0 }
  0x15   :  { %32 = vsyncpa [#allocation21], 0 }
  0x16   :  { %33 = vsyncpa [#allocation24], 0 }
  0x17   :  { %34 = vsyncpa [#allocation4], 0 }
  0x18   :  { %36 = vsyncpa [#allocation4 + $0x1], 0  ;;  %s3756_s0 = smov 0   ;;  %s3758_s30 = smov 0  }
  0x19   :  { %s3760_s20 = smov 0   ;;  %s3762_s21 = smov 0  }
  0x1a LB: > { %4536 = sst [smem:[#allocation35_spill]] %s3618_s0  ;;  %s3632_s1 = smov [#allocation5]   ;;  %s3630_s21 = sphi %s3762_s21, %s4591_s21   ;;  %s3626_s20 = sphi %s3760_s20, %s4590_s20   ;;  %s3622_s30 = sphi %s3758_s30, %s4589_s30   ;;  %s3618_s0 = sphi %s3756_s0, %s4588_s0  }
  0x1b   : > { %4537 = sst [smem:[#allocation36_spill]] %s3622_s30  ;;  %s495_s22 = sshll.u32 %s3632_s1, 4  ;;  %s3782_s22 = int_to_ptr.vmem [resolvable:$true] %s495_s22 }
  0x1c   : > { %s3777_s2 = sadd.s32 4294967295, %s3630_s21   ;;  %p2505_p0 = scmp.ge.s32.totalorder %s3630_s21, 1 }
  0x1d   : > { %4538 = sst [smem:[#allocation37_spill]] %s3777_s2  ;;  %p4516_p1 = scmp.eq.s32.totalorder %s3777_s2, 0 }
  0x1e   : > { %p477_p2 = scmp.lt.s32.totalorder %s3630_s21, 3  ;;  %s3633_s24 = smov [#allocation8]  }
  0x1f   : > { %s524_s25 = sshll.u32 %s3633_s24, 4  ;;  %s3634_s26 = smov [#allocation11]   ;;  %s3797_s25 = int_to_ptr.vmem [resolvable:$true] %s524_s25 }
  0x20   : > { %p3784_p3 = pnand %p2505_p0, %p477_p2  ;;  %s3799_s27 = sshll.u32 %s3634_s26, 4  ;;  %s551_s27 = int_to_ptr.vmem [resolvable:$true] %s3799_s27 }
  0x21   : > { %s4542_s1 = sld [smem:[#allocation42_spill]] }
  0x22   : > { %s4539_s23 = scalar_select %p3784_p3, 1, 0 }
  0x23   : > { %p2994_p5 = pneg %p3784_p3 }
  0x24   : > { %4540 = sst [smem:[#allocation38_spill]] %s4539_s23 }
  0x25   : > { %p3793_p6 = pnand %p2994_p5, %p4516_p1 }
  0x27   : > { %s3142_s19 = scalar_lea.hbm %s4542_s1, 32  ;;  %p3809_p8 = pneg %p3793_p6 }
  0x28   : > { %p3143_p7 = scmp.ne.s32.totalorder %s4542_s1, %s3142_s19  ;;  %p3149_p11 = scmp.lt.u32.totalorder %s3142_s19, %s4542_s1 }
  0x2a   : > { %p3145_p9 = pnand %p3809_p8, %p3143_p7 }
  0x2c   : > { %p3146_p10 = pneg %p3145_p9 }
  0x2e   : > { %p3151_p12 = pnand %p3149_p11, %p3146_p10 }
  0x30   : > { %3154 = shalt.err (!%p3151_p12)
}
  0x31   : > { %s3155_s12 = scalar_lea.vmem %s3782_s22, 32  ;;  %p3163_p5 = scmp.lt.s32.totalorder %s3782_s22, %s3782_s22 }
  0x32   : > { %p3156_p13 = scmp.ne.s32.totalorder %s3782_s22, %s3155_s12  ;;  %p3164_p4 = scmp.lt.s32.totalorder %s3155_s12, %s3155_s12 }
  0x34   : > { %p3158_p0 = pnand %p3156_p13, %p3809_p8  ;;  %p3165_p7 = por %p3164_p4, %p3163_p5 }
  0x36   : > { %p3159_p2 = pneg %p3158_p0 }
  0x38   : > { %p3166_p9 = pnand %p3165_p7, %p3159_p2 }
  0x3a   : > { %3169 = shalt.err (!%p3166_p9)
}
  0x3b   : > { %s4514_s18 = smov 16   ;;  %s4518_s4 = smov 1  }
  0x3c   : > { %2997 = dma.hbm_to_vmem [thread:$0]  (!%p3793_p6), %s4542_s1, 32, %s3782_s22, [#allocation6], %s4514_s18, %s4514_s18, %s4518_s4  }
  0x3d   : > { %s4544_s6 = sld [smem:[#allocation45_spill]] }
  0x43   : > { %s3170_s12 = scalar_lea.hbm %s4544_s6, 1024 }
  0x44   : > { %p3171_p4 = scmp.ne.s32.totalorder %s4544_s6, %s3170_s12  ;;  %p3177_p12 = scmp.lt.u32.totalorder %s3170_s12, %s4544_s6 }
  0x46   : > { %p3173_p10 = pnand %p3171_p4, %p3809_p8 }
  0x48   : > { %p3174_p11 = pneg %p3173_p10 }
  0x4a   : > { %p3179_p13 = pnand %p3177_p12, %p3174_p11 }
  0x4c   : > { %3182 = shalt.err (!%p3179_p13)
}
  0x4d   : > { %s3183_s22 = scalar_lea.vmem %s3797_s25, 1024  ;;  %p3191_p7 = scmp.lt.s32.totalorder %s3797_s25, %s3797_s25 }
  0x4e   : > { %p3184_p0 = scmp.ne.s32.totalorder %s3797_s25, %s3183_s22  ;;  %p3192_p9 = scmp.lt.s32.totalorder %s3183_s22, %s3183_s22 }
  0x50   : > { %p3186_p2 = pnand %p3184_p0, %p3809_p8  ;;  %p3193_p4 = por %p3192_p9, %p3191_p7 }
  0x52   : > { %p3187_p5 = pneg %p3186_p2 }
  0x54   : > { %p3194_p10 = pnand %p3193_p4, %p3187_p5 }
  0x56   : > { %3197 = shalt.err (!%p3194_p10)
}
  0x57   : > { %s3637_s2 = smov 128   ;;  %s3638_s0 = smov 8  }
  0x58   : > { %3003 = dma.hbm_to_vmem [thread:$0]  (!%p3793_p6), %s4544_s6, 1024, %s3797_s25, [#allocation9], %s3637_s2, %s3637_s2, %s3638_s0  }
  0x59   : > { %s4545_s8 = sld [smem:[#allocation47_spill]] }
  0x5f   : > { %s3198_s29 = scalar_lea.hbm %s4545_s8, 1024 }
  0x60   : > { %p3199_p11 = scmp.ne.s32.totalorder %s4545_s8, %s3198_s29  ;;  %p3205_p0 = scmp.lt.u32.totalorder %s3198_s29, %s4545_s8 }
  0x62   : > { %p3201_p12 = pnand %p3199_p11, %p3809_p8 }
  0x64   : > { %p3202_p13 = pneg %p3201_p12 }
  0x66   : > { %p3207_p2 = pnand %p3205_p0, %p3202_p13 }
  0x68   : > { %3210 = shalt.err (!%p3207_p2)
}
  0x69   : > { %s3211_s30 = scalar_lea.vmem %s551_s27, 1024  ;;  %p3219_p4 = scmp.lt.s32.totalorder %s551_s27, %s551_s27 }
  0x6a   : > { %p3212_p5 = scmp.ne.s32.totalorder %s551_s27, %s3211_s30  ;;  %p3220_p10 = scmp.lt.s32.totalorder %s3211_s30, %s3211_s30 }
  0x6c   : > { %p3214_p7 = pnand %p3212_p5, %p3809_p8  ;;  %p3221_p1 = por %p3220_p10, %p3219_p4 }
  0x6e   : > { %p3215_p9 = pneg %p3214_p7 }
  0x70   : > { %p3222_p3 = pnand %p3221_p1, %p3215_p9 }
  0x72   : > { %3225 = shalt.err (!%p3222_p3)
}
  0x73   : > { %3009 = dma.hbm_to_vmem [thread:$0]  (!%p3793_p6), %s4545_s8, 1024, %s551_s27, [#allocation12], %s3637_s2, %s3637_s2, %s3638_s0  }
  0x74   : > { %s3639_s18 = smov [#allocation14]   ;;  %s3640_s28 = smov [#allocation17]  }
  0x75   : > { %s576_s19 = sshll.u32 %s3639_s18, 4  ;;  %s605_s29 = sshll.u32 %s3640_s28, 4  ;;  %s577_s19 = int_to_ptr.vmem [resolvable:$true] %s576_s19  ;;  %s606_s29 = int_to_ptr.vmem [resolvable:$true] %s605_s29 }
  0x76   : > { %s3226_s22 = scalar_lea.hbm %s4491_s10, 32 }
  0x77   : > { %p3227_p1 = scmp.ne.s32.totalorder %s4491_s10, %s3226_s22  ;;  %p3233_p12 = scmp.lt.u32.totalorder %s3226_s22, %s4491_s10 }
  0x79   : > { %p3229_p3 = pnand %p3227_p1, %p3809_p8 }
  0x7b   : > { %p3230_p11 = pneg %p3229_p3 }
  0x7d   : > { %p3235_p13 = pnand %p3233_p12, %p3230_p11 }
  0x7f   : > { %3238 = shalt.err (!%p3235_p13)
}
  0x80   : > { %s3239_s27 = scalar_lea.vmem %s577_s19, 32  ;;  %p3247_p7 = scmp.lt.s32.totalorder %s577_s19, %s577_s19 }
  0x81   : > { %p3240_p0 = scmp.ne.s32.totalorder %s577_s19, %s3239_s27  ;;  %p3248_p9 = scmp.lt.s32.totalorder %s3239_s27, %s3239_s27 }
  0x83   : > { %p3242_p2 = pnand %p3240_p0, %p3809_p8  ;;  %p3249_p4 = por %p3248_p9, %p3247_p7 }
  0x85   : > { %p3243_p5 = pneg %p3242_p2 }
  0x87   : > { %p3250_p10 = pnand %p3249_p4, %p3243_p5 }
  0x89   : > { %3253 = shalt.err (!%p3250_p10)
}
  0x8a   : > { %s4546_s4 = smov 1   ;;  %s4547_s2 = smov 16  }
  0x8b   : > { %3015 = dma.hbm_to_vmem [thread:$0]  (!%p3793_p6), %s4491_s10, 32, %s577_s19, [#allocation15], %s4547_s2, %s4547_s2, %s4546_s4  }
  0x8c   : > { %s3254_s28 = scalar_lea.hbm %s4494_s13, 32 }
  0x8d   : > { %p3255_p1 = scmp.ne.s32.totalorder %s4494_s13, %s3254_s28  ;;  %p3261_p12 = scmp.lt.u32.totalorder %s3254_s28, %s4494_s13 }
  0x8f   : > { %p3257_p3 = pnand %p3255_p1, %p3809_p8 }
  0x91   : > { %p3258_p11 = pneg %p3257_p3 }
  0x93   : > { %p3263_p13 = pnand %p3261_p12, %p3258_p11 }
  0x95   : > { %3266 = shalt.err (!%p3263_p13)
}
  0x96   : > { %s3267_s25 = scalar_lea.vmem %s606_s29, 32  ;;  %p3275_p7 = scmp.lt.s32.totalorder %s606_s29, %s606_s29 }
  0x97   : > { %p3268_p0 = scmp.ne.s32.totalorder %s606_s29, %s3267_s25  ;;  %p3276_p9 = scmp.lt.s32.totalorder %s3267_s25, %s3267_s25 }
  0x99   : > { %p3270_p2 = pnand %p3268_p0, %p3809_p8  ;;  %p3277_p4 = por %p3276_p9, %p3275_p7 }
  0x9b   : > { %p3271_p5 = pneg %p3270_p2 }
  0x9d   : > { %p3278_p10 = pnand %p3277_p4, %p3271_p5 }
  0x9f   : > { %3281 = shalt.err (!%p3278_p10)
}
  0xa0   : > { %3021 = dma.hbm_to_vmem [thread:$0]  (!%p3793_p6), %s4494_s13, 32, %s606_s29, [#allocation18], %s4547_s2, %s4547_s2, %s4546_s4  }
  0xa1   : > { %s3641_s1 = smov [#allocation20]   ;;  %s3642_s23 = smov [#allocation7]  }
  0xa2   : > { %s631_s0 = sshll.u32 %s3641_s1, 4  ;;  %s511_s18 = sshll.u32 %s3642_s23, 4  ;;  %s632_s0 = int_to_ptr.vmem [resolvable:$true] %s631_s0  ;;  %s512_s18 = int_to_ptr.vmem [resolvable:$true] %s511_s18 }
  0xa3   : > { %s3282_s12 = scalar_lea.hbm %s4496_s15, 32 }
  0xa4   : > { %p3283_p1 = scmp.ne.s32.totalorder %s4496_s15, %s3282_s12  ;;  %p3289_p12 = scmp.lt.u32.totalorder %s3282_s12, %s4496_s15 }
  0xa6   : > { %p3285_p3 = pnand %p3283_p1, %p3809_p8 }
  0xa8   : > { %p3286_p11 = pneg %p3285_p3 }
  0xaa   : > { %p3291_p13 = pnand %p3289_p12, %p3286_p11 }
  0xac   : > { %3294 = shalt.err (!%p3291_p13)
}
  0xad   : > { %s3295_s29 = scalar_lea.vmem %s632_s0, 32  ;;  %p3303_p7 = scmp.lt.s32.totalorder %s632_s0, %s632_s0 }
  0xae   : > { %p3296_p0 = scmp.ne.s32.totalorder %s632_s0, %s3295_s29  ;;  %p3304_p9 = scmp.lt.s32.totalorder %s3295_s29, %s3295_s29 }
  0xb0   : > { %p3298_p2 = pnand %p3296_p0, %p3809_p8  ;;  %p3305_p4 = por %p3304_p9, %p3303_p7 }
  0xb2   : > { %p3299_p5 = pneg %p3298_p2 }
  0xb4   : > { %p3306_p10 = pnand %p3305_p4, %p3299_p5 }
  0xb6   : > { %3309 = shalt.err (!%p3306_p10)
}
  0xb7   : > { %3027 = dma.hbm_to_vmem [thread:$0]  (!%p3793_p6), %s4496_s15, 32, %s632_s0, [#allocation21], %s4547_s2, %s4547_s2, %s4546_s4  }
  0xb8   : > { %s4548_s5 = sld [smem:[#allocation44_spill]] }
  0xbe   : > { %s3310_s26 = scalar_lea.hbm %s4548_s5, 32 }
  0xbf   : > { %p3311_p1 = scmp.ne.s32.totalorder %s4548_s5, %s3310_s26  ;;  %p3317_p12 = scmp.lt.u32.totalorder %s3310_s26, %s4548_s5 }
  0xc1   : > { %p3313_p3 = pnand %p3311_p1, %p3809_p8 }
  0xc3   : > { %p3314_p11 = pneg %p3313_p3 }
  0xc5   : > { %p3319_p13 = pnand %p3317_p12, %p3314_p11 }
  0xc7   : > { %3322 = shalt.err (!%p3319_p13)
}
  0xc8   : > { %s3323_s19 = scalar_lea.vmem %s512_s18, 32  ;;  %p3331_p7 = scmp.lt.s32.totalorder %s512_s18, %s512_s18 }
  0xc9   : > { %p3324_p0 = scmp.ne.s32.totalorder %s512_s18, %s3323_s19  ;;  %p3332_p9 = scmp.lt.s32.totalorder %s3323_s19, %s3323_s19 }
  0xcb   : > { %p3326_p2 = pnand %p3324_p0, %p3809_p8  ;;  %p3333_p4 = por %p3332_p9, %p3331_p7 }
  0xcd   : > { %p3327_p5 = pneg %p3326_p2 }
  0xcf   : > { %p3334_p10 = pnand %p3333_p4, %p3327_p5 }
  0xd1   : > { %3337 = shalt.err (!%p3334_p10)
}
  0xd2   : > { %3000 = dma.hbm_to_vmem [thread:$0]  (!%p3793_p6), %s4548_s5, 32, %s512_s18, [#allocation6], %s4547_s2, %s4547_s2, %s4546_s4  }
  0xd3   : > { %s3643_s27 = smov [#allocation10]   ;;  %s3644_s23 = smov [#allocation13]  }
  0xd4   : > { %s537_s1 = sshll.u32 %s3643_s27, 4  ;;  %s563_s28 = sshll.u32 %s3644_s23, 4  ;;  %s538_s1 = int_to_ptr.vmem [resolvable:$true] %s537_s1  ;;  %s564_s28 = int_to_ptr.vmem [resolvable:$true] %s563_s28 }
  0xd5   : > { %s4549_s7 = sld [smem:[#allocation46_spill]] }
  0xdb   : > { %s3338_s22 = scalar_lea.hbm %s4549_s7, 32 }
  0xdc   : > { %p3339_p1 = scmp.ne.s32.totalorder %s4549_s7, %s3338_s22  ;;  %p3345_p12 = scmp.lt.u32.totalorder %s3338_s22, %s4549_s7 }
  0xde   : > { %p3341_p3 = pnand %p3339_p1, %p3809_p8 }
  0xe0   : > { %p3342_p11 = pneg %p3341_p3 }
  0xe2   : > { %p3347_p13 = pnand %p3345_p12, %p3342_p11 }
  0xe4   : > { %3350 = shalt.err (!%p3347_p13)
}
  0xe5   : > { %s3351_s18 = scalar_lea.vmem %s538_s1, 32  ;;  %p3359_p7 = scmp.lt.s32.totalorder %s538_s1, %s538_s1 }
  0xe6   : > { %p3352_p0 = scmp.ne.s32.totalorder %s538_s1, %s3351_s18  ;;  %p3360_p9 = scmp.lt.s32.totalorder %s3351_s18, %s3351_s18 }
  0xe8   : > { %p3354_p2 = pnand %p3352_p0, %p3809_p8  ;;  %p3361_p4 = por %p3360_p9, %p3359_p7 }
  0xea   : > { %p3355_p5 = pneg %p3354_p2 }
  0xec   : > { %p3362_p10 = pnand %p3361_p4, %p3355_p5 }
  0xee   : > { %3365 = shalt.err (!%p3362_p10)
}
  0xef   : > { %3006 = dma.hbm_to_vmem [thread:$0]  (!%p3793_p6), %s4549_s7, 32, %s538_s1, [#allocation9], %s4547_s2, %s4547_s2, %s4546_s4  }
  0xf0   : > { %s4550_s9 = sld [smem:[#allocation48_spill]] }
  0xf6   : > { %s3366_s12 = scalar_lea.hbm %s4550_s9, 32 }
  0xf7   : > { %p3367_p1 = scmp.ne.s32.totalorder %s4550_s9, %s3366_s12  ;;  %p3373_p12 = scmp.lt.u32.totalorder %s3366_s12, %s4550_s9 }
  0xf9   : > { %p3369_p3 = pnand %p3367_p1, %p3809_p8 }
  0xfb   : > { %p3370_p11 = pneg %p3369_p3 }
  0xfd   : > { %p3375_p13 = pnand %p3373_p12, %p3370_p11 }
  0xff   : > { %3378 = shalt.err (!%p3375_p13)
}
 0x100   : > { %s3379_s0 = scalar_lea.vmem %s564_s28, 32  ;;  %p3387_p7 = scmp.lt.s32.totalorder %s564_s28, %s564_s28 }
 0x101   : > { %p3380_p0 = scmp.ne.s32.totalorder %s564_s28, %s3379_s0  ;;  %p3388_p9 = scmp.lt.s32.totalorder %s3379_s0, %s3379_s0 }
 0x103   : > { %p3382_p2 = pnand %p3380_p0, %p3809_p8  ;;  %p3389_p4 = por %p3388_p9, %p3387_p7 }
 0x105   : > { %p3383_p5 = pneg %p3382_p2 }
 0x107   : > { %p3390_p10 = pnand %p3389_p4, %p3383_p5 }
 0x109   : > { %3393 = shalt.err (!%p3390_p10)
}
 0x10a   : > { %3012 = dma.hbm_to_vmem [thread:$0]  (!%p3793_p6), %s4550_s9, 32, %s564_s28, [#allocation12], %s4547_s2, %s4547_s2, %s4546_s4  }
 0x10b   : > { %s3645_s29 = smov [#allocation16]   ;;  %s3646_s23 = smov [#allocation19]  }
 0x10c   : > { %s589_s27 = sshll.u32 %s3645_s29, 4  ;;  %s618_s26 = sshll.u32 %s3646_s23, 4  ;;  %s590_s27 = int_to_ptr.vmem [resolvable:$true] %s589_s27  ;;  %s619_s26 = int_to_ptr.vmem [resolvable:$true] %s618_s26 }
 0x10d   : > { %s3394_s30 = scalar_lea.hbm %s4492_s11, 32 }
 0x10e   : > { %p3395_p1 = scmp.ne.s32.totalorder %s4492_s11, %s3394_s30  ;;  %p3401_p12 = scmp.lt.u32.totalorder %s3394_s30, %s4492_s11 }
 0x110   : > { %p3397_p3 = pnand %p3395_p1, %p3809_p8 }
 0x112   : > { %p3398_p11 = pneg %p3397_p3 }
 0x114   : > { %p3403_p13 = pnand %p3401_p12, %p3398_p11 }
 0x116   : > { %3406 = shalt.err (!%p3403_p13)
}
 0x117   : > { %s3407_s28 = scalar_lea.vmem %s590_s27, 32  ;;  %p3415_p7 = scmp.lt.s32.totalorder %s590_s27, %s590_s27 }
 0x118   : > { %p3408_p0 = scmp.ne.s32.totalorder %s590_s27, %s3407_s28  ;;  %p3416_p9 = scmp.lt.s32.totalorder %s3407_s28, %s3407_s28 }
 0x11a   : > { %p3410_p2 = pnand %p3408_p0, %p3809_p8  ;;  %p3417_p4 = por %p3416_p9, %p3415_p7 }
 0x11c   : > { %p3411_p5 = pneg %p3410_p2 }
 0x11e   : > { %p3418_p10 = pnand %p3417_p4, %p3411_p5 }
 0x120   : > { %3421 = shalt.err (!%p3418_p10)
}
 0x121   : > { %3018 = dma.hbm_to_vmem [thread:$0]  (!%p3793_p6), %s4492_s11, 32, %s590_s27, [#allocation15], %s4547_s2, %s4547_s2, %s4546_s4  }
 0x122   : > { %s3422_s22 = scalar_lea.hbm %s4495_s14, 32 }
 0x123   : > { %p3423_p1 = scmp.ne.s32.totalorder %s4495_s14, %s3422_s22  ;;  %p3429_p12 = scmp.lt.u32.totalorder %s3422_s22, %s4495_s14 }
 0x125   : > { %p3425_p3 = pnand %p3423_p1, %p3809_p8 }
 0x127   : > { %p3426_p11 = pneg %p3425_p3 }
 0x129   : > { %p3431_p13 = pnand %p3429_p12, %p3426_p11 }
 0x12b   : > { %3434 = shalt.err (!%p3431_p13)
}
 0x12c   : > { %s3435_s1 = scalar_lea.vmem %s619_s26, 32  ;;  %p3443_p7 = scmp.lt.s32.totalorder %s619_s26, %s619_s26 }
 0x12d   : > { %p3436_p0 = scmp.ne.s32.totalorder %s619_s26, %s3435_s1  ;;  %p3444_p9 = scmp.lt.s32.totalorder %s3435_s1, %s3435_s1 }
 0x12f   : > { %p3438_p2 = pnand %p3436_p0, %p3809_p8  ;;  %p3445_p4 = por %p3444_p9, %p3443_p7 }
 0x131   : > { %p3439_p5 = pneg %p3438_p2 }
 0x133   : > { %p3446_p10 = pnand %p3445_p4, %p3439_p5 }
 0x135   : > { %3449 = shalt.err (!%p3446_p10)
}
 0x136   : > { %3024 = dma.hbm_to_vmem [thread:$0]  (!%p3793_p6), %s4495_s14, 32, %s619_s26, [#allocation18], %s4547_s2, %s4547_s2, %s4546_s4  }
 0x137   : > { %s3647_s18 = smov [#allocation22]   ;;  %s3648_s23 = smov [#allocation23]  }
 0x138   : > { %s645_s29 = sshll.u32 %s3647_s18, 4  ;;  %s656_s12 = sshll.u32 %s3648_s23, 4  ;;  %s646_s29 = int_to_ptr.vmem [resolvable:$true] %s645_s29  ;;  %s657_s12 = int_to_ptr.vmem [resolvable:$true] %s656_s12 }
 0x139   : > { %s3450_s25 = scalar_lea.hbm %s4497_s16, 16 }
 0x13a   : > { %p3451_p1 = scmp.ne.s32.totalorder %s4497_s16, %s3450_s25  ;;  %p3457_p12 = scmp.lt.u32.totalorder %s3450_s25, %s4497_s16 }
 0x13c   : > { %p3453_p3 = pnand %p3451_p1, %p3809_p8 }
 0x13e   : > { %p3454_p11 = pneg %p3453_p3 }
 0x140   : > { %p3459_p13 = pnand %p3457_p12, %p3454_p11 }
 0x142   : > { %3462 = shalt.err (!%p3459_p13)
}
 0x143   : > { %s3463_s4 = scalar_lea.vmem %s646_s29, 16  ;;  %s3470_s2 = scalar_lea.vmem %s646_s29, 32 }
 0x144   : > { %p3464_p0 = scmp.ne.s32.totalorder %s646_s29, %s3463_s4  ;;  %p3471_p7 = scmp.lt.s32.totalorder %s646_s29, %s646_s29 }
 0x145   : > { %p3472_p9 = scmp.lt.s32.totalorder %s3470_s2, %s3463_s4 }
 0x146   : > { %p3466_p2 = pnand %p3464_p0, %p3809_p8 }
 0x147   : > { %p3473_p4 = por %p3472_p9, %p3471_p7 }
 0x148   : > { %p3467_p5 = pneg %p3466_p2 }
 0x14a   : > { %p3474_p10 = pnand %p3473_p4, %p3467_p5 }
 0x14c   : > { %3477 = shalt.err (!%p3474_p10)
}
 0x14d   : > { %3030 = dma.hbm_to_vmem [thread:$0]  (!%p3793_p6), %s4497_s16, 16, %s646_s29, [#allocation21]  }
 0x14e   : > { %s3478_s22 = scalar_lea.hbm %s4498_s17, 16 }
 0x14f   : > { %p3479_p1 = scmp.ne.s32.totalorder %s4498_s17, %s3478_s22  ;;  %p3485_p12 = scmp.lt.u32.totalorder %s3478_s22, %s4498_s17 }
 0x151   : > { %p3481_p3 = pnand %p3479_p1, %p3809_p8 }
 0x153   : > { %p3482_p11 = pneg %p3481_p3 }
 0x155   : > { %p3487_p13 = pnand %p3485_p12, %p3482_p11 }
 0x157   : > { %3490 = shalt.err (!%p3487_p13)
}
 0x158   : > { %s3491_s1 = scalar_lea.vmem %s657_s12, 16  ;;  %s3498_s29 = scalar_lea.vmem %s657_s12, 32 }
 0x159   : > { %p3492_p0 = scmp.ne.s32.totalorder %s657_s12, %s3491_s1  ;;  %p3499_p7 = scmp.lt.s32.totalorder %s657_s12, %s657_s12 }
 0x15a   : > { %p3500_p9 = scmp.lt.s32.totalorder %s3498_s29, %s3491_s1 }
 0x15b   : > { %p3494_p2 = pnand %p3492_p0, %p3809_p8 }
 0x15c   : > { %p3501_p4 = por %p3500_p9, %p3499_p7 }
 0x15d   : > { %p3495_p5 = pneg %p3494_p2 }
 0x15f   : > { %p3502_p10 = pnand %p3501_p4, %p3495_p5 }
 0x161   : > { %3505 = shalt.err (!%p3502_p10)
}
 0x162   : > { %s4551_s2 = sld [smem:[#allocation36_spill]]  ;;  %s4552_s24 = sld [smem:[#allocation35_spill]] }
 0x163   : > { %s4553_s26 = sld [smem:[#allocation37_spill]]  ;;  %s2504_s28 = sadd.s32 4294967294, %s3630_s21  }
 0x164   : > { %3033 = dma.hbm_to_vmem [thread:$0]  (!%p3793_p6), %s4498_s17, 16, %s657_s12, [#allocation24]  }
 0x165   : > { %s4081_s3 = sadd.s32 1, %s3630_s21   ;;  %s49_s18 = sadd.s32 1, %s3626_s20 }
 0x166   : > { %s46_s23 = ssub.s32 %s3630_s21, %s4081_s3  ;;  %p57_p3 = scmp.eq.s32.totalorder %s3630_s21, 0 }
 0x167   : > { %p47_p1 = scmp.eq.s32.totalorder %s46_s23, 0  ;;  %p470_p5 = scmp.eq.s32.totalorder %s2504_s28, 1 }
 0x168   : > { %p56_p8 = scmp.ne.s32.totalorder %s3626_s20, %s4551_s2  ;;  %p62_p11 = scmp.ne.s32.totalorder %s4551_s2, %s4552_s24 }
 0x169   : > { %p464_p12 = scmp.eq.s32.totalorder %s4553_s26, 1  ;;  %p4554_p0 = scmp.eq.s32.totalorder %s4553_s26, 0 }
 0x16a   : > { %s4093_s22 = scalar_select %p47_p1, %s3626_s20, %s49_s18  }
 0x16b   : > { %p58_p13 = por %p57_p3, %p56_p8  ;;  %p4097_p2 = por %p4554_p0, %p62_p11 }
 0x16c   : > { %p4101_p6 = por %p464_p12, %p56_p8  ;;  %p3055_p7 = scmp.lt.s32.totalorder %s3630_s21, 2 }
 0x16d   : > { %s670_s25 = sand.u32 1, %s3626_s20   ;;  %p4107_p9 = por %p470_p5, %p62_p11 }
 0x16e   : > { %s4556_s12 = scalar_select %p4101_p6, 1, 0 }
 0x16f   : > { %s4557_s19 = scalar_select %p4107_p9, 1, 0 }
 0x170   : > { %s2520_s0 = sshll.u32 %s3630_s21, 4  ;;  %s4558_s27 = sld [smem:[#allocation39_spill]] }
 0x171   : > { %s673_s2 = scalar_lea.vmem [#allocation2], %s670_s25  ;;  %p4119_p4 = pnand %p3055_p7, %p58_p13 }
 0x172   : > { %s680_s24 = sshll.u32 %s673_s2, 4  ;;  %s671_s28 = scalar_lea.sflag [#allocation3], %s670_s25  ;;  %s4117_s24 = int_to_ptr.vmem [resolvable:$true] %s680_s24 }
 0x173   : > { %p3508_p8 = pneg %p4119_p4 }
 0x176   : > { %s4115_s4 = scalar_lea.hbm %s4558_s27, %s2520_s0  ;;  %s3511_s1 = scalar_lea.hbm %s4558_s27, 32 }
 0x177   : > { %s3506_s18 = scalar_lea.hbm %s4115_s4, 16  ;;  %p3512_p11 = scmp.lt.u32.totalorder %s4115_s4, %s4558_s27 }
 0x178   : > { %p3507_p10 = scmp.ne.s32.totalorder %s4115_s4, %s3506_s18  ;;  %p3513_p12 = scmp.lt.u32.totalorder %s3511_s1, %s3506_s18 }
 0x179   : > { %p3515_p0 = scmp.lt.u32.totalorder %s3506_s18, %s4115_s4 }
 0x17a   : > { %p3509_p1 = pnand %p3508_p8, %p3507_p10  ;;  %p3514_p13 = por %p3513_p12, %p3512_p11 }
 0x17c   : > { %p3510_p3 = pneg %p3509_p1  ;;  %p3516_p5 = por %p3515_p0, %p3514_p13 }
 0x17e   : > { %p3517_p7 = pnand %p3516_p5, %p3510_p3 }
 0x180   : > { %3520 = shalt.err (!%p3517_p7)
}
 0x181   : > { %s3521_s25 = scalar_lea.vmem %s4117_s24, 16  ;;  %s3649_s23 = smov [#allocation2]  }
 0x182   : > { %p3522_p10 = scmp.ne.s32.totalorder %s4117_s24, %s3521_s25  ;;  %s3526_s0 = sshll.u32 %s3649_s23, 4  ;;  %s3527_s0 = int_to_ptr.vmem [resolvable:$false] %s3526_s0 }
 0x183   : > { %s3528_s29 = scalar_lea.vmem %s3527_s0, 32  ;;  %p3529_p6 = scmp.lt.s32.totalorder %s4117_s24, %s3527_s0 }
 0x184   : > { %p3524_p1 = pnand %p3522_p10, %p3508_p8  ;;  %p3530_p11 = scmp.lt.s32.totalorder %s3528_s29, %s3521_s25 }
 0x186   : > { %p3525_p9 = pneg %p3524_p1  ;;  %p3531_p12 = por %p3530_p11, %p3529_p6 }
 0x188   : > { %p3532_p13 = pnand %p3531_p12, %p3525_p9 }
 0x18a   : > { %3535 = shalt.err (!%p3532_p13)
}
 0x18b   : > { %3037 = dma.hbm_to_vmem [thread:$0]  (!%p4119_p4), %s4115_s4, 16, %s4117_s24, %s671_s28  }
 0x18c   : > { %s4560_s18 = sld [smem:[#allocation38_spill]] }
 0x192   : > { %p4561_p3 = scmp.ne.s32.totalorder %s4560_s18, 0 }
 0x193   : > { %s4562_s1 = sld [smem:[#allocation36_spill]] (!%p4561_p3) }
 0x194   : > { %689 = sbr.rel (%p4561_p3) target bundleno = 5351 (0x14e7), region = 96 }
 0x199   : > { %s4151_s2 = sand.u32 (!%p4561_p3), 1, %s4562_s1  }
 0x19a   : > { %s692_s23 = scalar_lea.sflag (!%p4561_p3), [#allocation3], %s4151_s2  ;;  %s694_s0 = scalar_lea.vmem (!%p4561_p3), [#allocation2], %s4151_s2 }
 0x19b   : > { %3581 = dma.done.wait (%p4097_p2), %s692_s23, 16  }
 0x19c   : > { %3583 = vsyncadd (%p4097_p2), %s692_s23, 4294967280  ;;  %s4563_s26 = sld [smem:[#allocation37_spill]] }
 0x1a2   : > { %p4564_p6 = scmp.eq.s32.totalorder %s4563_s26, 0 }
 0x1a4   : > { %3585 = dma.done.wait (%p4564_p6), [#allocation6], 64   ;;  %p4565_p9 = pmov %p4564_p6 }
 0x1a5   : > { %p4566_p4 = pmov %p4564_p6 }
 0x1a6   : > { %3587 = vsyncadd (%p4565_p9), [#allocation6], 4294967232 }
 0x1a7   : > { %3589 = dma.done.wait (%p4566_p4), [#allocation9], 1056   ;;  %p4567_p8 = pmov %p4566_p4 }
 0x1a8   : > { %p4568_p0 = pmov %p4566_p4 }
 0x1a9   : > { %3591 = vsyncadd (%p4567_p8), [#allocation9], 4294966240 }
 0x1aa   : > { %3593 = dma.done.wait (%p4568_p0), [#allocation12], 1056   ;;  %p4569_p5 = pmov %p4568_p0 }
 0x1ab   : > { %p4570_p2 = pmov %p4568_p0 }
 0x1ac   : > { %3595 = vsyncadd (%p4569_p5), [#allocation12], 4294966240 }
 0x1ad   : > { %3597 = dma.done.wait (%p4570_p2), [#allocation15], 64   ;;  %p4571_p7 = pmov %p4568_p0 }
 0x1ae   : > { %p4572_p10 = pmov %p4568_p0 }
 0x1af   : > { %3599 = vsyncadd (%p4571_p7), [#allocation15], 4294967232 }
 0x1b0   : > { %3601 = dma.done.wait (%p4572_p10), [#allocation18], 64   ;;  %p4573_p1 = pmov %p4568_p0 }
 0x1b1   : > { %p4574_p11 = pmov %p4568_p0 }
 0x1b2   : > { %3603 = vsyncadd (%p4573_p1), [#allocation18], 4294967232 }
 0x1b3   : > { %3605 = dma.done.wait (%p4574_p11), [#allocation21], 48   ;;  %p4575_p12 = pmov %p4568_p0 }
 0x1b4   : > { %p4576_p13 = pmov %p4568_p0 }
 0x1b5   : > { %3607 = vsyncadd (%p4575_p12), [#allocation21], 4294967248 }
 0x1b6   : > { %3609 = dma.done.wait (%p4576_p13), [#allocation24], 16   ;;  %p4577_p3 = pmov %p4568_p0 }
 0x1b7   : > { %v3650_v0 = vmov 0.0|0.0   ;;  %vm3651_vm0 = vmmov 0   ;;  %v3652_v1 = vmov 0.0   ;;  %v2536_v2 = vld [vmem:[%s694_s0] ss:$0 sm:$0xff]  ;;  %s4578_s24 = sld [smem:[#allocation40_spill]]  ;;  %v808_v33 = vlaneseq }
 0x1b8   : > { %3611 = vsyncadd (%p4577_p3), [#allocation24], 4294967280  ;;  %2848 = vmatprep.subr.bf16.mxu0 %v3650_v0  ;;  %2704 = vmatprep.mubr.msk.f32.mxu0 %vm3651_vm0, %v3652_v1  ;;  %s4579_s29 = sld [smem:[#allocation41_spill]]  ;;  %v3653_v36 = vmov 1.0   ;;  %s4580_s1 = sld [smem:[#allocation43_spill]]  ;;  %vm914_vm2 = vcmask 261120  }
 0x1b9   : > { %2872 = vmatprep.subr.bf16.mxu1 %v3650_v0  ;;  %2715 = vmatprep.mubr.msk.f32.mxu1 %vm3651_vm0, %v3652_v1  ;;  %v809_v34 = vand.u32 127, %v808_v33  ;;  %v1069_v45 = vld [vmem:[#allocation8] sm:$0xff]  ;;  %v1070_v46 = vld [vmem:[#allocation8 + $0x8] sm:$0xff]  ;;  %v1071_v48 = vld [vmem:[#allocation8 + $0x10] sm:$0xff]  ;;  %v900_v63 = vshrl.u32 %v808_v33, 7  ;;  %vm1228_vm4 = vcmask 64512  }
 0x1ba   : > { %806 = vbcast.lane.b32.xlu0 %v2536_v2, 256  ;;  %v2885_v47 = vpack.c.bf16 %v1070_v46, %v1069_v45  ;;  %v1072_v49 = vld [vmem:[#allocation8 + $0x18] sm:$0xff]  ;;  %v2543_v59 = vld [vmem:[#allocation10] ss:$0 sm:$0xff]  ;;  %s4581_s28 = sld [smem:[#allocation49_spill]]  ;;  %s4582_s23 = sld [smem:[#allocation50_spill]] }
 0x1bb   : > { %v2888_v50 = vpack.c.bf16 %v1072_v49, %v1071_v48  ;;  %v2541_v53 = vld [vmem:[#allocation7] ss:$0 sm:$0xff]  ;;  %v2539_v55 = vld [vmem:[#allocation5] ss:$0 sm:$0xff]  ;;  %vm901_vm3 = vcmp.le.s32.totalorder %v809_v34, %v900_v63  ;;  %v2550_v46 = vld [vmem:[#allocation14] ss:$0 sm:$0xff] }
 0x1bc   : > { %v2551_v48 = vld [vmem:[#allocation16] ss:$0 sm:$0xff]  ;;  %s2535_s4 = sshll.u32 %s4151_s2, 3  ;;  %s2589_s0 = sshll.u32 %s4563_s26, 7 }
 0x1bd   : > { %v813_v3 = vld [vmem:[%s4578_s24] sm:$0xff]  ;;  %v814_v4 = vld [vmem:[%s4578_s24 + $0x8] sm:$0xff]  ;;  %v815_v6 = vld [vmem:[%s4578_s24 + $0x10] sm:$0xff]  ;;  %s799_s25 = scalar_lea.vmem [#allocation25], %s2535_s4  ;;  %s4583_s6 = sld [smem:[#allocation51_spill]] }
 0x1be   : > { %v2849_v5 = vpack.c.bf16 %v814_v4, %v813_v3  ;;  %v816_v7 = vld [vmem:[%s4578_s24 + $0x18] sm:$0xff]  ;;  %v817_v9 = vld [vmem:[%s4578_s24 + $0x20] sm:$0xff]  ;;  %v818_v10 = vld [vmem:[%s4578_s24 + $0x28] sm:$0xff]  ;;  %v3654_v3 = vmov -1e+09   ;;  %s2313_s18 = sshll.u32 %s799_s25, 4  ;;  %s4434_s18 = int_to_ptr.vmem [resolvable:$true] %s2313_s18 }
 0x1bf   : > { %v2852_v8 = vpack.c.bf16 %v816_v7, %v815_v6  ;;  %v903_v11 = vld [vmem:[%s4579_s29] sm:$0xff]  ;;  %v904_v12 = vld [vmem:[%s4579_s29 + $0x8] sm:$0xff]  ;;  %v905_v13 = vld [vmem:[%s4579_s29 + $0x10] sm:$0xff]  ;;  %v2855_v15 = vpack.c.bf16 %v818_v10, %v817_v9  ;;  %v4301_v4 = vsel %vm901_vm3, 0.0, %v3654_v3  ;;  %s2300_s8 = scalar_lea.sflag [#allocation4], %s4151_s2  ;;  %p4584_p9 = scmp.ne.s32.totalorder %s4556_s12, 0 }
 0x1c0   : > { %2850 = vmatpush3.bf16.msra.mxu0 %v2849_v5  ;;  %v906_v14 = vld [vmem:[%s4579_s29 + $0x18] sm:$0xff]  ;;  %v2873_v16 = vpack.c.bf16 %v904_v12, %v903_v11  ;;  %v819_v17 = vld [vmem:[%s4578_s24 + $0x30] sm:$0xff]  ;;  %v821_v21 = vld [vmem:[%s4578_s24 + $0x40] sm:$0xff]  ;;  %s3655_s26 = smov [#allocation25]  }
 0x1c1   : > { %2851 = vmatprep.subr.bf16.mxu0 %v3650_v0  ;;  %v820_v18 = vld [vmem:[%s4578_s24 + $0x38] sm:$0xff]  ;;  %v2876_v19 = vpack.c.bf16 %v906_v14, %v905_v13  ;;  %v822_v22 = vld [vmem:[%s4578_s24 + $0x48] sm:$0xff]  ;;  %v823_v24 = vld [vmem:[%s4578_s24 + $0x50] sm:$0xff]  ;;  %s3540_s4 = sshll.u32 %s3655_s26, 4  ;;  %s3541_s4 = int_to_ptr.vmem [resolvable:$false] %s3540_s4 }
 0x1c2   : > { %2874 = vmatpush3.bf16.msra.mxu1 %v2873_v16  ;;  %v2858_v20 = vpack.c.bf16 %v820_v18, %v819_v17  ;;  %v2861_v23 = vpack.c.bf16 %v822_v22, %v821_v21  ;;  %v824_v25 = vld [vmem:[%s4578_s24 + $0x58] sm:$0xff]  ;;  %v825_v27 = vld [vmem:[%s4578_s24 + $0x60] sm:$0xff]  ;;  %v826_v28 = vld [vmem:[%s4578_s24 + $0x68] sm:$0xff]  ;;  %s3542_s9 = scalar_lea.vmem %s3541_s4, 256  ;;  %p3543_p0 = scmp.lt.s32.totalorder %s4434_s18, %s3541_s4 }
 0x1c3   : > { %2875 = vmatprep.subr.bf16.mxu1 %v3650_v0  ;;  %v2864_v26 = vpack.c.bf16 %v824_v25, %v823_v24  ;;  %v2867_v29 = vpack.c.bf16 %v826_v28, %v825_v27  ;;  %v827_v30 = vld [vmem:[%s4578_s24 + $0x70] sm:$0xff]  ;;  %v828_v31 = vld [vmem:[%s4578_s24 + $0x78] sm:$0xff]  ;;  %v988_v37 = vld [vmem:[%s4580_s1] sm:$0xff]  ;;  %s4439_s7 = scalar_lea.hbm %s4583_s6, %s2589_s0 }
 0x1c4   : > { %2853 = vmatpush3.bf16.msra.mxu0 %v2852_v8  ;;  %v2870_v32 = vpack.c.bf16 %v828_v31, %v827_v30  ;;  %v989_v38 = vld [vmem:[%s4580_s1 + $0x8] sm:$0xff]  ;;  %v990_v40 = vld [vmem:[%s4580_s1 + $0x10] sm:$0xff]  ;;  %v991_v41 = vld [vmem:[%s4580_s1 + $0x18] sm:$0xff] }
 0x1c5   : > { %2854 = vmatprep.subr.bf16.mxu0 %v3650_v0  ;;  %v2879_v39 = vpack.c.bf16 %v989_v38, %v988_v37  ;;  %v2882_v44 = vpack.c.bf16 %v991_v41, %v990_v40  ;;  %v1313_v14 = vld [vmem:[#allocation11] sm:$0xff]  ;;  %v1315_v16 = vld [vmem:[#allocation11 + $0x10] sm:$0xff]  ;;  %v1316_v18 = vld [vmem:[#allocation11 + $0x18] sm:$0xff] }
 0x1c6   : > { %2877 = vmatpush3.bf16.msra.mxu1 %v2876_v19  ;;  %v2894_v19 = vpack.c.bf16 %v1316_v18, %v1315_v16  ;;  %v2548_v25 = vld [vmem:[#allocation13] ss:$0 sm:$0xff]  ;;  %v1431_v40 = vld [vmem:[%s4581_s28 + $0x18] sm:$0xff]  ;;  %v2562_v3 = vld [vmem:[%s4580_s1 + $0x20] sm:$0xff] }
 0x1c7   : > { %2878 = vmatprep.subr.bf16.mxu1 %v3650_v0  ;;  %v1429_v37 = vld [vmem:[%s4581_s28 + $0x8] sm:$0xff] }
 0x1c8   : > { %2856 = vmatpush3.bf16.msra.mxu0 %v2855_v15  ;;  %v1314_v15 = vld [vmem:[#allocation11 + $0x8] sm:$0xff]  ;;  %v2557_v63 = vld [vmem:[%s4579_s29 + $0x28] sm:$0xff] }
 0x1c9   : > { %2857 = vmatprep.subr.bf16.mxu0 %v3650_v0  ;;  %v2891_v17 = vpack.c.bf16 %v1314_v15, %v1313_v14 }
 0x1cc   : > { %2859 = vmatpush3.bf16.msra.mxu0 %v2858_v20 }
 0x1cd   : > { %2860 = vmatprep.subr.bf16.mxu0 %v3650_v0 }
 0x1d0   : > { %2862 = vmatpush3.bf16.msra.mxu0 %v2861_v23 }
 0x1d1   : > { %2863 = vmatprep.subr.bf16.mxu0 %v3650_v0 }
 0x1d4   : > { %2865 = vmatpush3.bf16.msra.mxu0 %v2864_v26 }
 0x1d5   : > { %2866 = vmatprep.subr.bf16.mxu0 %v3650_v0 }
 0x1d8   : > { %2868 = vmatpush3.bf16.msra.mxu0 %v2867_v29 }
 0x1d9   : > { %2869 = vmatprep.subr.bf16.mxu0 %v3650_v0 }
 0x1dc   : > { %2871 = vmatpush3.bf16.msra.mxu0 %v2870_v32 }
 0x1dd   : > { %2890 = vmatprep.subr.bf16.mxu0 %v3650_v0 }
 0x22c   : > { %v807_v35 = vpop.permute.xlu0 %806 }
 0x22d   : > { %vm810_vm1 = vcmp.eq.s32.totalorder %v809_v34, %v807_v35 }
 0x22e   : > { %2705 = vmatmul.mubr.msk.f32.vlgmr.msra.gmra.mrb[0].mxu0 %vm810_vm1, %v3653_v36  ;;  %v1428_v36 = vld [vmem:[%s4581_s28] sm:$0xff] }
 0x22f   : > { %2758 = vmatprep.mubr.msk.f32.mxu0 %vm3651_vm0, %v3652_v1  ;;  %2892 = vmatpush3.bf16.msra.mxu0 %v2891_v17  ;;  %v2897_v38 = vpack.c.bf16 %v1429_v37, %v1428_v36  ;;  %v2554_v17 = vld [vmem:[#allocation19] ss:$0 sm:$0xff]  ;;  %v2568_v36 = vld [vmem:[#allocation10 + $0x1] ss:$0 sm:$0xff] }
 0x230   : > { %2893 = vmatprep.subr.bf16.mxu0 %v3650_v0 }
 0x233   : > { %2895 = vmatpush3.bf16.msra.mxu0 %v2894_v19  ;;  %v1712_v19 = vld [vmem:[#allocation8 + $0x20] sm:$0xff] }
 0x234   : > { %2902 = vmatprep.subr.bf16.mxu0 %v3650_v0 }
 0x301   : > { %v4277_v42 = vpop.f32.mrb[0].mxu0 }
 0x302   : > { %v2706_v43 = vpop.f32.mrb[1].mxu0  ;;  %2716 = vmatmul.mubr.msk.f32.vlgmr.msra.gmra.mrb[0].mxu1 %vm914_vm2, %v4277_v42 }
 0x303   : > { %2880 = vmatpush3.bf16.msra.mxu1 %v2879_v39  ;;  %2726 = vmatprep.mubr.msk.f32.mxu1 %vm3651_vm0, %v3652_v1  ;;  %v1430_v39 = vld [vmem:[%s4581_s28 + $0x10] sm:$0xff] }
 0x304   : > { %2881 = vmatprep.subr.bf16.mxu1 %v3650_v0  ;;  %v2900_v41 = vpack.c.bf16 %v1431_v40, %v1430_v39 }
 0x307   : > { %2883 = vmatpush3.bf16.msra.mxu1 %v2882_v44 }
 0x308   : > { %2884 = vmatprep.subr.bf16.mxu1 %v3650_v0 }
 0x30a   : > { %2727 = vmatmul.mubr.msk.f32.vlgmr.msra.gmra.mrb[2].mxu1 %vm914_vm2, %v4277_v42 }
 0x30b   : > { %2886 = vmatpush3.bf16.msra.mxu1 %v2885_v47  ;;  %2737 = vmatprep.mubr.msk.f32.mxu1 %vm3651_vm0, %v3652_v1 }
 0x30c   : > { %2887 = vmatprep.subr.bf16.mxu1 %v3650_v0 }
 0x30f   : > { %2889 = vmatpush3.bf16.msra.mxu1 %v2888_v50 }
 0x310   : > { %2740 = vmatprep.subr.mxu1 %v3652_v1 }
 0x312   : > { %2738 = vmatmul.mubr.msk.f32.vlgmr.msra.gmra.mrb[4].mxu1 %vm914_vm2, %v4277_v42 }
 0x313   : > { %2742 = vmatprep.mubr.msk.f32.mxu1 %vm3651_vm0, %v3652_v1 }
 0x3d5   : > { %v984_v51 = vpop.f32.mrb[0].mxu1 }
 0x3d6   : > { %v2717_v52 = vpop.f32.mrb[1].mxu1  ;;  %v985_v58 = vadd.f32 %v2539_v55, %v984_v51  ;;  %v2552_v51 = vld [vmem:[#allocation17] ss:$0 sm:$0xff] }
 0x3dd   : > { %v1065_v54 = vpop.f32.mrb[2].mxu1 }
 0x3de   : > { %v1066_v56 = vadd.f32 %v2541_v53, %v1065_v54  ;;  %v2728_v57 = vpop.f32.mrb[3].mxu1 }
 0x3e0   : > { %2741 = vmatpush3.xpose.msk.msra.mxu1 %vm914_vm2, %v1066_v56 }
 0x3e1   : > { %2745 = vmatprep.subr.mxu1 %v3652_v1 }
 0x3e3   : > { %2743 = vmatmul.mubr.msk.f32.vlgmr.msra.gmra.mrb[6].mxu1 %vm914_vm2, %v985_v58 }
 0x3e4   : > { %2747 = vmatprep.mubr.msk.f32.mxu1 %vm3651_vm0, %v3652_v1 }
 0x3e5   : > { %v1146_v60 = vpop.f32.mrb[4].mxu1 }
 0x3e6   : > { %v1147_v61 = vadd.f32 %v2543_v59, %v1146_v60  ;;  %v2739_v62 = vpop.f32.mrb[5].mxu1 }
 0x3e7   : > { %v2556_v62 = vld [vmem:[%s4579_s29 + $0x20] sm:$0xff] }
 0x3e8   : > { %2746 = vmatpush3.msra.mxu1 %v1147_v61 }
 0x3e9   : > { %2896 = vmatprep.subr.bf16.mxu1 %v3650_v0 }
 0x4b6   : > { %v1222_v2 = vpop.f32.mrb[6].mxu1 }
 0x4b7   : > { %v1226_v5 = vmul.f32 0.17677669, %v1222_v2  ;;  %v2744_v6 = vpop.f32.mrb[7].mxu1  ;;  %v2903_v2 = vpack.c.bf16 %v2557_v63, %v2556_v62 }
 0x4b9   : > { %v1227_v7 = vadd.f32 %v1226_v5, %v4301_v4  ;;  %v2563_v5 = vld [vmem:[%s4580_s1 + $0x28] sm:$0xff] }
 0x4ba   : > { %v2909_v6 = vpack.c.bf16 %v2563_v5, %v2562_v3 }
 0x4bb   : > { %v1229_v8 = vsel %vm1228_vm4, %v1227_v7, -inf }
 0x4bc   : > { %1230 = vmax.xlane.f32.xlu0 %v1229_v8  ;;  %v2559_v8 = vld [vmem:[%s4579_s29 + $0x38] sm:$0xff] }
 0x549   : > { %v1231_v9 = vpop.xlane.xlu0 %1230 }
 0x54a   : > { %v1232_v10 = vsub.f32 %v1227_v7, %v1231_v9  ;;  %v2558_v7 = vld [vmem:[%s4579_s29 + $0x30] sm:$0xff] }
 0x54b   : > { %v2906_v9 = vpack.c.bf16 %v2559_v8, %v2558_v7 }
 0x54c   : > { %v1233_v11 = vmul.f32 1.442695, %v1232_v10  ;;  %v2564_v10 = vld [vmem:[%s4580_s1 + $0x30] sm:$0xff] }
 0x54e   : > { %3124 = vpow2.f32 %v1233_v11  ;;  %v2565_v11 = vld [vmem:[%s4580_s1 + $0x38] sm:$0xff]  ;;  %s3536_s1 = scalar_lea.vmem %s4434_s18, 128 }
 0x54f   : > { %p3537_p6 = scmp.ne.s32.totalorder %s4434_s18, %s3536_s1  ;;  %p3544_p5 = scmp.lt.s32.totalorder %s3542_s9, %s3536_s1 }
 0x551   : > { %p3538_p4 = pnand %p3537_p6, %p4584_p9  ;;  %p3545_p2 = por %p3544_p5, %p3543_p0 }
 0x553   : > { %p3539_p8 = pneg %p3538_p4 }
 0x555   : > { %p3546_p7 = pnand %p3545_p2, %p3539_p8 }
 0x558   : > { %v3125_v12 = vpop.eup %3124 }
 0x559   : > { %v1235_v13 = vsel %vm1228_vm4, %v3125_v12, 0.0 }
 0x55a   : > { %1236 = vadd.xlane.f32.xlu1 %v1235_v13 }
 0x5e7   : > { %v1237_v20 = vpop.xlane.xlu1 %1236 }
 0x5e8   : > { %3126 = vrcp.f32 %v1237_v20  ;;  %v1713_v20 = vld [vmem:[#allocation8 + $0x28] sm:$0xff] }
 0x5f2   : > { %v3127_v21 = vpop.eup %3126 }
 0x5f3   : > { %v1239_v22 = vmul.f32 %v3127_v21, %v3125_v12  ;;  %v2912_v12 = vpack.c.bf16 %v2565_v11, %v2564_v10  ;;  %v2555_v21 = vld [vmem:[#allocation20] ss:$0 sm:$0xff]  ;;  %v2578_v10 = vld [vmem:[%s4581_s28 + $0x28] sm:$0xff] }
 0x5f5   : > { %2748 = vmatmul.mubr.msk.f32.vlgmr.msra.gmra.mrb[8].mxu1 %vm1228_vm4, %v1239_v22 }
 0x5f6   : > { %2769 = vmatprep.mubr.msk.f32.mxu1 %vm3651_vm0, %v3652_v1  ;;  %2898 = vmatpush3.bf16.msra.mxu1 %v2897_v38 }
 0x5f7   : > { %2899 = vmatprep.subr.bf16.mxu1 %v3650_v0 }
 0x5fa   : > { %2901 = vmatpush3.bf16.msra.mxu1 %v2900_v41 }
 0x5fb   : > { %2908 = vmatprep.subr.bf16.mxu1 %v3650_v0 }
 0x6c8   : > { %v1309_v23 = vpop.f32.mrb[8].mxu1 }
 0x6c9   : > { %v2749_v24 = vpop.f32.mrb[9].mxu1  ;;  %2759 = vmatmul.mubr.msk.f32.vlgmr.msra.gmra.mrb[2].mxu0 %vm914_vm2, %v1309_v23  ;;  %v2915_v23 = vpack.c.bf16 %v1713_v20, %v1712_v19  ;;  %v2575_v19 = vld [vmem:[#allocation14 + $0x1] ss:$0 sm:$0xff] }
 0x6ca   : > { %2780 = vmatprep.mubr.msk.f32.mxu0 %vm3651_vm0, %v3652_v1  ;;  %2904 = vmatpush3.bf16.msra.mxu0 %v2903_v2 }
 0x6cb   : > { %2905 = vmatprep.subr.bf16.mxu0 %v3650_v0 }
 0x6ce   : > { %2907 = vmatpush3.bf16.msra.mxu0 %v2906_v9 }
 0x6cf   : > { %2914 = vmatprep.subr.bf16.mxu0 %v3650_v0 }
 0x79c   : > { %v1393_v26 = vpop.f32.mrb[2].mxu0 }
 0x79d   : > { %v1394_v27 = vadd.f32 %v2548_v25, %v1393_v26  ;;  %v2760_v28 = vpop.f32.mrb[3].mxu0  ;;  %v1714_v25 = vld [vmem:[#allocation8 + $0x30] sm:$0xff]  ;;  %v1715_v26 = vld [vmem:[#allocation8 + $0x38] sm:$0xff] }
 0x79e   : > { %v2566_v28 = vld [vmem:[#allocation7 + $0x1] ss:$0 sm:$0xff] }
 0x79f   : > { %v1397_v29 = vadd.f32 %v1394_v27, %v4277_v42  ;;  %v2918_v27 = vpack.c.bf16 %v1715_v26, %v1714_v25 }
 0x7a1   : > { %v1400_v30 = vsel %vm914_vm2, %v1397_v29, 0.0 }
 0x7a2   : > { %1401 = vadd.xlane.f32.xlu1 %v1400_v30 }
 0x82f   : > { %v1402_v31 = vpop.xlane.xlu1 %1401 }
 0x830   : > { %v1404_v32 = vmul.f32 0.03125, %v1402_v31  ;;  %v2560_v31 = vld [vmem:[#allocation5 + $0x1] ss:$0 sm:$0xff] }
 0x832   : > { %v1405_v33 = vsub.f32 %v1397_v29, %v1404_v32 }
 0x834   : > { %v1406_v34 = vmul.f32 %v1405_v33, %v1405_v33 }
 0x836   : > { %v1407_v35 = vsel %vm914_vm2, %v1406_v34, 0.0 }
 0x837   : > { %1408 = vadd.xlane.f32.xlu1 %v1407_v35 }
 0x8c4   : > { %v1409_v42 = vpop.xlane.xlu1 %1408 }
 0x8c5   : > { %v1410_v43 = vmul.f32 0.03125, %v1409_v42 }
 0x8c7   : > { %v1411_v44 = vadd.f32 1e-05, %v1410_v43 }
 0x8c9   : > { %3128 = vrsqrt.f32 %v1411_v44 }
 0x8d3   : > { %v3129_v45 = vpop.eup %3128 }
 0x8d4   : > { %v1413_v47 = vmul.f32 %v3129_v45, %v1405_v33 }
 0x8d6   : > { %v1420_v49 = vmul.f32 %v2550_v46, %v1413_v47 }
 0x8d8   : > { %v1427_v50 = vadd.f32 %v2551_v48, %v1420_v49 }
 0x8da   : > { %2770 = vmatmul.mubr.msk.f32.vlgmr.msra.gmra.mrb[10].mxu1 %vm914_vm2, %v1427_v50 }
 0x8db   : > { %2791 = vmatprep.mubr.msk.f32.mxu1 %vm3651_vm0, %v3652_v1  ;;  %2910 = vmatpush3.bf16.msra.mxu1 %v2909_v6 }
 0x8dc   : > { %2911 = vmatprep.subr.bf16.mxu1 %v3650_v0 }
 0x8df   : > { %2913 = vmatpush3.bf16.msra.mxu1 %v2912_v12  ;;  %v2579_v12 = vld [vmem:[%s4581_s28 + $0x30] sm:$0xff] }
 0x8e0   : > { %2805 = vmatprep.subr.mxu1 %v3652_v1 }
 0x9ad   : > { %v1508_v52 = vpop.f32.mrb[10].mxu1 }
 0x9ae   : > { %v1509_v53 = vadd.f32 %v2552_v51, %v1508_v52  ;;  %v2771_v54 = vpop.f32.mrb[11].mxu1  ;;  %v1958_v51 = vld [vmem:[#allocation11 + $0x28] sm:$0xff]  ;;  %v1959_v52 = vld [vmem:[#allocation11 + $0x30] sm:$0xff] }
 0x9af   : > { %v1960_v54 = vld [vmem:[#allocation11 + $0x38] sm:$0xff] }
 0x9b0   : > { %v1512_v55 = vadd.f32 %v1509_v53, %v1427_v50  ;;  %v1957_v50 = vld [vmem:[#allocation11 + $0x20] sm:$0xff] }
 0x9b1   : > { %v2921_v53 = vpack.c.bf16 %v1958_v51, %v1957_v50  ;;  %v2221_v50 = vld [vmem:[%s4582_s23] sm:$0xff]  ;;  %v2222_v51 = vld [vmem:[%s4582_s23 + $0x8] sm:$0xff] }
 0x9b2   : > { %v1515_v56 = vsel %vm914_vm2, %v1512_v55, 0.0 }
 0x9b3   : > { %1516 = vadd.xlane.f32.xlu1 %v1515_v56 }
 0xa40   : > { %v1517_v57 = vpop.xlane.xlu1 %1516 }
 0xa41   : > { %v1518_v58 = vmul.f32 0.03125, %v1517_v57 }
 0xa43   : > { %v1519_v59 = vsub.f32 %v1512_v55, %v1518_v58  ;;  %v2924_v55 = vpack.c.bf16 %v1960_v54, %v1959_v52  ;;  %v2933_v52 = vpack.c.bf16 %v2222_v51, %v2221_v50  ;;  %v2224_v54 = vld [vmem:[%s4582_s23 + $0x18] sm:$0xff] }
 0xa45   : > { %v1520_v60 = vmul.f32 %v1519_v59, %v1519_v59 }
 0xa47   : > { %v1521_v61 = vsel %vm914_vm2, %v1520_v60, 0.0  ;;  %v2573_v60 = vld [vmem:[#allocation13 + $0x1] ss:$0 sm:$0xff] }
 0xa48   : > { %1522 = vadd.xlane.f32.xlu1 %v1521_v61 }
 0xad5   : > { %v1523_v13 = vpop.xlane.xlu1 %1522 }
 0xad6   : > { %v1524_v14 = vmul.f32 0.03125, %v1523_v13  ;;  %v2580_v13 = vld [vmem:[%s4581_s28 + $0x38] sm:$0xff] }
 0xad8   : > { %v1525_v15 = vadd.f32 1e-05, %v1524_v14  ;;  %v2930_v14 = vpack.c.bf16 %v2580_v13, %v2579_v12 }
 0xada   : > { %3130 = vrsqrt.f32 %v1525_v15 }
 0xae4   : > { %v3131_v16 = vpop.eup %3130 }
 0xae5   : > { %v1527_v18 = vmul.f32 %v3131_v16, %v1519_v59 }
 0xae7   : > { %v1534_v22 = vmul.f32 %v2554_v17, %v1527_v18 }
 0xae9   : > { %v4364_v24 = vadd.f32 %v2555_v21, %v1534_v22  ;;  %v2576_v21 = vld [vmem:[#allocation16 + $0x1] ss:$0 sm:$0xff] }
 0xaeb   : > { %2781 = vmatmul.mubr.msk.f32.vlgmr.msra.gmra.mrb[4].mxu0 %vm914_vm2, %v4364_v24  ;;  %2792 = vmatmul.mubr.msk.f32.vlgmr.msra.gmra.mrb[12].mxu1 %vm914_vm2, %v4364_v24 }
 0xaec   : > { %2916 = vmatpush3.bf16.msra.mxu0 %v2915_v23  ;;  %2802 = vmatprep.mubr.msk.f32.mxu0 %vm3651_vm0, %v3652_v1 }
 0xaed   : > { %2917 = vmatprep.subr.bf16.mxu0 %v3650_v0  ;;  %2807 = vmatprep.mubr.msk.f32.mxu1 %vm3651_vm0, %v3652_v1 }
 0xaf0   : > { %2919 = vmatpush3.bf16.msra.mxu0 %v2918_v27 }
 0xaf1   : > { %2920 = vmatprep.subr.bf16.mxu0 %v3650_v0 }
 0xaf3   : > { %2803 = vmatmul.mubr.msk.f32.vlgmr.msra.gmra.mrb[6].mxu0 %vm914_vm2, %v4364_v24 }
 0xaf4   : > { %2823 = vmatprep.mubr.msk.f32.mxu0 %vm3651_vm0, %v3652_v1  ;;  %2922 = vmatpush3.bf16.msra.mxu0 %v2921_v53  ;;  %v2223_v53 = vld [vmem:[%s4582_s23 + $0x10] sm:$0xff] }
 0xaf5   : > { %2923 = vmatprep.subr.bf16.mxu0 %v3650_v0 }
 0xaf8   : > { %2925 = vmatpush3.bf16.msra.mxu0 %v2924_v55  ;;  %v2936_v55 = vpack.c.bf16 %v2224_v54, %v2223_v53 }
 0xaf9   : > { %2932 = vmatprep.subr.bf16.mxu0 %v3650_v0 }
 0xbbe   : > { %v1624_v29 = vpop.f32.mrb[4].mxu0  ;;  %v1707_v30 = vpop.f32.mrb[12].mxu1 }
 0xbbf   : > { %v1708_v32 = vadd.f32 %v2566_v28, %v1707_v30  ;;  %v2782_v33 = vpop.f32.mrb[5].mxu0  ;;  %v2793_v34 = vpop.f32.mrb[13].mxu1  ;;  %v1625_v35 = vadd.f32 %v2560_v31, %v1624_v29 }
 0xbc1   : > { %2806 = vmatpush3.xpose.msk.msra.mxu1 %vm914_vm2, %v1708_v32 }
 0xbc2   : > { %2810 = vmatprep.subr.mxu1 %v3652_v1 }
 0xbc4   : > { %2808 = vmatmul.mubr.msk.f32.vlgmr.msra.gmra.mrb[14].mxu1 %vm914_vm2, %v1625_v35 }
 0xbc5   : > { %2812 = vmatprep.mubr.msk.f32.mxu1 %vm3651_vm0, %v3652_v1 }
 0xbc6   : > { %v1790_v37 = vpop.f32.mrb[6].mxu0 }
 0xbc7   : > { %v1791_v38 = vadd.f32 %v2568_v36, %v1790_v37  ;;  %v2804_v39 = vpop.f32.mrb[7].mxu0 }
 0xbc8   : > { %v2583_v39 = vld [vmem:[#allocation19 + $0x1] ss:$0 sm:$0xff] }
 0xbc9   : > { %2811 = vmatpush3.msra.mxu1 %v1791_v38 }
 0xbca   : > { %2926 = vmatprep.subr.bf16.mxu1 %v3650_v0 }
 0xc97   : > { %v1866_v40 = vpop.f32.mrb[14].mxu1 }
 0xc98   : > { %v1870_v41 = vmul.f32 0.17677669, %v1866_v40  ;;  %v2809_v42 = vpop.f32.mrb[15].mxu1 }
 0xc9a   : > { %v1871_v43 = vadd.f32 %v1870_v41, %v4301_v4  ;;  %v2584_v41 = vld [vmem:[#allocation20 + $0x1] ss:$0 sm:$0xff] }
 0xc9c   : > { %v1872_v44 = vsel %vm1228_vm4, %v1871_v43, -inf }
 0xc9d   : > { %1873 = vmax.xlane.f32.xlu1 %v1872_v44 }
 0xd2a   : > { %v1874_v45 = vpop.xlane.xlu1 %1873 }
 0xd2b   : > { %v1875_v46 = vsub.f32 %v1871_v43, %v1874_v45 }
 0xd2d   : > { %v1876_v47 = vmul.f32 1.442695, %v1875_v46 }
 0xd2f   : > { %3132 = vpow2.f32 %v1876_v47 }
 0xd39   : > { %v3133_v48 = vpop.eup %3132 }
 0xd3a   : > { %v1878_v49 = vsel %vm1228_vm4, %v3133_v48, 0.0 }
 0xd3b   : > { %1879 = vadd.xlane.f32.xlu1 %v1878_v49 }
 0xdc8   : > { %v1880_v4 = vpop.xlane.xlu1 %1879 }
 0xdc9   : > { %3134 = vrcp.f32 %v1880_v4 }
 0xdd3   : > { %v3135_v56 = vpop.eup %3134 }
 0xdd4   : > { %v1882_v57 = vmul.f32 %v3135_v56, %v3133_v48 }
 0xdd6   : > { %2813 = vmatmul.mubr.msk.f32.vlgmr.msra.gmra.mrb[16].mxu1 %vm1228_vm4, %v1882_v57 }
 0xdd7   : > { %2834 = vmatprep.mubr.msk.f32.mxu1 %vm3651_vm0, %v3652_v1 }
 0xea9   : > { %v1952_v58 = vpop.f32.mrb[16].mxu1 }
 0xeaa   : > { %v2814_v59 = vpop.f32.mrb[17].mxu1  ;;  %2824 = vmatmul.mubr.msk.f32.vlgmr.msra.gmra.mrb[8].mxu0 %vm914_vm2, %v1952_v58 }
 0xeab   : > { %2845 = vmatprep.mubr.msk.f32.mxu0 %vm3651_vm0, %v3652_v1  ;;  %v2577_v1 = vld [vmem:[%s4581_s28 + $0x20] sm:$0xff]  ;;  %2934 = vmatpush3.bf16.msra.mxu0 %v2933_v52  ;;  %v2585_v59 = vld [vmem:[#allocation22] ss:$0 sm:$0xff] }
 0xeac   : > { %v2927_v11 = vpack.c.bf16 %v2578_v10, %v2577_v1  ;;  %2935 = vmatprep.subr.bf16.mxu0 %v3650_v0 }
 0xeae   : > { %2928 = vmatpush3.bf16.msra.mxu1 %v2927_v11 }
 0xeaf   : > { %2929 = vmatprep.subr.bf16.mxu1 %v3650_v0  ;;  %2937 = vmatpush3.bf16.msra.mxu0 %v2936_v55 }
 0xeb2   : > { %2931 = vmatpush3.bf16.msra.mxu1 %v2930_v14 }
 0xf7d   : > { %v2038_v61 = vpop.f32.mrb[8].mxu0 }
 0xf7e   : > { %v2039_v62 = vadd.f32 %v2573_v60, %v2038_v61  ;;  %v2825_v63 = vpop.f32.mrb[9].mxu0  ;;  %v2586_v60 = vld [vmem:[#allocation23] ss:$0 sm:$0xff] }
 0xf80   : > { %v2042_v2 = vadd.f32 %v2039_v62, %v4364_v24  ;;  %v2581_v24 = vld [vmem:[#allocation17 + $0x1] ss:$0 sm:$0xff] }
 0xf82   : > { %v2047_v3 = vsel %vm914_vm2, %v2042_v2, 0.0 }
 0xf83   : > { %2048 = vadd.xlane.f32.xlu1 %v2047_v3 }
0x1010   : > { %v2049_v5 = vpop.xlane.xlu1 %2048 }
0x1011   : > { %v2050_v6 = vmul.f32 0.03125, %v2049_v5 }
0x1013   : > { %v2051_v7 = vsub.f32 %v2042_v2, %v2050_v6 }
0x1015   : > { %v2052_v8 = vmul.f32 %v2051_v7, %v2051_v7 }
0x1017   : > { %v2053_v9 = vsel %vm914_vm2, %v2052_v8, 0.0 }
0x1018   : > { %2054 = vadd.xlane.f32.xlu1 %v2053_v9 }
0x10a5   : > { %v2055_v15 = vpop.xlane.xlu1 %2054 }
0x10a6   : > { %v2056_v16 = vmul.f32 0.03125, %v2055_v15 }
0x10a8   : > { %v2057_v17 = vadd.f32 1e-05, %v2056_v16 }
0x10aa   : > { %3136 = vrsqrt.f32 %v2057_v17 }
0x10b4   : > { %v3137_v18 = vpop.eup %3136 }
0x10b5   : > { %v2059_v20 = vmul.f32 %v3137_v18, %v2051_v7 }
0x10b7   : > { %v2066_v22 = vmul.f32 %v2575_v19, %v2059_v20 }
0x10b9   : > { %v2073_v23 = vadd.f32 %v2576_v21, %v2066_v22 }
0x10bb   : > { %2835 = vmatmul.mubr.msk.f32.vlgmr.msra.gmra.mrb[18].mxu1 %vm914_vm2, %v2073_v23 }
0x118e   : > { %v2156_v25 = vpop.f32.mrb[18].mxu1 }
0x118f   : > { %v2157_v26 = vadd.f32 %v2581_v24, %v2156_v25  ;;  %v2836_v27 = vpop.f32.mrb[19].mxu1 }
0x1191   : > { %v2160_v28 = vadd.f32 %v2157_v26, %v2073_v23 }
0x1193   : > { %v2165_v29 = vsel %vm914_vm2, %v2160_v28, 0.0 }
0x1194   : > { %2166 = vadd.xlane.f32.xlu0 %v2165_v29 }
0x1221   : > { %v2167_v30 = vpop.xlane.xlu0 %2166 }
0x1222   : > { %v2168_v31 = vmul.f32 0.03125, %v2167_v30 }
0x1224   : > { %v2169_v32 = vsub.f32 %v2160_v28, %v2168_v31 }
0x1226   : > { %v2170_v33 = vmul.f32 %v2169_v32, %v2169_v32 }
0x1228   : > { %v2171_v34 = vsel %vm914_vm2, %v2170_v33, 0.0 }
0x1229   : > { %2172 = vadd.xlane.f32.xlu1 %v2171_v34 }
0x12b6   : > { %v2173_v35 = vpop.xlane.xlu1 %2172 }
0x12b7   : > { %v2174_v36 = vmul.f32 0.03125, %v2173_v35 }
0x12b9   : > { %v2175_v37 = vadd.f32 1e-05, %v2174_v36 }
0x12bb   : > { %3138 = vrsqrt.f32 %v2175_v37 }
0x12c5   : > { %v3139_v38 = vpop.eup %3138 }
0x12c6   : > { %v2177_v40 = vmul.f32 %v3139_v38, %v2169_v32 }
0x12c8   : > { %v2184_v42 = vmul.f32 %v2583_v39, %v2177_v40 }
0x12ca   : > { %v2191_v43 = vadd.f32 %v2584_v41, %v2184_v42 }
0x12cc   : > { %v2194_v44 = vsel %vm914_vm2, %v2191_v43, 0.0 }
0x12cd   : > { %2195 = vadd.xlane.f32.xlu0 %v2194_v44 }
0x135a   : > { %v2196_v45 = vpop.xlane.xlu0 %2195 }
0x135b   : > { %v2197_v46 = vmul.f32 0.03125, %v2196_v45 }
0x135d   : > { %v2198_v47 = vsub.f32 %v2191_v43, %v2197_v46 }
0x135f   : > { %v2199_v48 = vmul.f32 %v2198_v47, %v2198_v47 }
0x1361   : > { %v2200_v49 = vsel %vm914_vm2, %v2199_v48, 0.0 }
0x1362   : > { %2201 = vadd.xlane.f32.xlu1 %v2200_v49 }
0x13ef   : > { %v2202_v4 = vpop.xlane.xlu1 %2201 }
0x13f0   : > { %v2203_v56 = vmul.f32 0.03125, %v2202_v4 }
0x13f2   : > { %v2204_v57 = vadd.f32 1e-05, %v2203_v56 }
0x13f4   : > { %3140 = vrsqrt.f32 %v2204_v57 }
0x13fe   : > { %v3141_v58 = vpop.eup %3140 }
0x13ff   : > { %v2206_v0 = vmul.f32 %v3141_v58, %v2198_v47 }
0x1401   : > { %v2213_v61 = vmul.f32 %v2585_v59, %v2206_v0 }
0x1403   : > { %v2220_v62 = vadd.f32 %v2586_v60, %v2213_v61 }
0x1405   : > { %2846 = vmatmul.mubr.msk.f32.vlgmr.msra.gmra.mrb[10].mxu0 %vm914_vm2, %v2220_v62 }
0x14d8   : > { %v2294_v63 = vpop.f32.mrb[10].mxu0 }
0x14d9   : > { %2298 = vst [vmem:[%s799_s25] sm:$0xff] %v2294_v63  ;;  %v2847_v2 = vpop.f32.mrb[11].mxu0 }
0x14da   : > { %3549 = shalt.err (!%p3546_p7)
}
0x14db   : > { %s3550_s2 = scalar_lea.hbm %s4439_s7, 128  ;;  %s3554_s5 = scalar_lea.hbm %s4583_s6, 256 }
0x14dc   : > { %p3551_p10 = scmp.ne.s32.totalorder %s4439_s7, %s3550_s2  ;;  %p3555_p12 = scmp.lt.u32.totalorder %s4439_s7, %s4583_s6 }
0x14dd   : > { %p3556_p13 = scmp.lt.u32.totalorder %s3554_s5, %s3550_s2  ;;  %p3558_p6 = scmp.lt.u32.totalorder %s3550_s2, %s4439_s7 }
0x14de   : > { %p3552_p1 = pnand %p3551_p10, %p4584_p9 }
0x14df   : > { %p3557_p3 = por %p3556_p13, %p3555_p12 }
0x14e0   : > { %p3553_p11 = pneg %p3552_p1 }
0x14e1   : > { %p3559_p4 = por %p3558_p6, %p3557_p3 }
0x14e3   : > { %p3560_p8 = pnand %p3559_p4, %p3553_p11 }
0x14e5   : > { %3563 = shalt.err (!%p3560_p8)
}
0x14e6   : > { %2992 = dma.vmem_to_hbm [thread:$0]  (%p4584_p9), %s4434_s18, 128, %s4439_s7, %s2300_s8  }
0x14e7 PF: > { %s4585_s9 = sld [smem:[#allocation35_spill]]  ;;  %p4586_p0 = scmp.ne.s32.totalorder %s4557_s19, 0 }
0x14e8   : > { %p4587_p5 = scmp.ge.s32.totalorder %s3630_s21, 2 }
0x14ea   : > { %p3039_p2 = pnand %p4587_p5, %p4586_p0 }
0x14ed   : > { %s2325_s1 = sand.u32 1, %s4585_s9  }
0x14ee   : > { %s2326_s4 = scalar_lea.sflag [#allocation4], %s2325_s1 }
0x14ef   : > { %3613 = dma.done.wait (!%p3039_p2), %s2326_s4, 128  }
0x14f0   : > { %3615 = vsyncadd (!%p3039_p2), %s2326_s4, 4294967168  ;;  %s4588_s0 = sld [smem:[#allocation36_spill]]  ;;  %p39_p7 = scmp.ge.s32.totalorder %s4081_s3, 4  }
0x14f1   : > { %s4589_s30 = smov %s3626_s20  ;;  %s4590_s20 = smov %s4093_s22 }
0x14f2   : > { %s4591_s21 = smov %s4081_s3  ;;  %41 = sbr.rel (!%p39_p7) target bundleno = 26 (0x1a), region = 207 }
0x14f9   :  { %2331 = vsyncpa [#allocation3], 1 }
0x14fa   :  { %2333 = vsyncpa [#allocation3 + $0x1], 1 }
0x14fb   :  { %2334 = vsyncpa [#allocation6], 1 }
0x14fc   :  { %2335 = vsyncpa [#allocation9], 1 }
0x14fd   :  { %2336 = vsyncpa [#allocation12], 1 }
0x14fe   :  { %2337 = vsyncpa [#allocation15], 1 }
0x14ff   :  { %2338 = vsyncpa [#allocation18], 1 }
0x1500   :  { %2339 = vsyncpa [#allocation21], 1 }
0x1501   :  { %2340 = vsyncpa [#allocation24], 1 }
0x1502   :  { %2341 = vsyncpa [#allocation4], 1 }
0x1503   :  { %2343 = vsyncpa [#allocation4 + $0x1], 1 }

</bundles_post_ra>
